<compile_context>
chip_gen: v7x
topology: tpu7x:2x2x1
jax: 0.10.0
libtpu: 0.0.40
codegen_flags: <defaults>
</compile_context>

<pallas_src>
import functools

import jax
import jax.numpy as jnp
from jax.experimental import pallas as pl
from jax.experimental.pallas import tpu as pltpu


def _round_up(x, m):
    return ((x + m - 1) // m) * m


# ---------------------------------------------------------------------------
# Degree / mask construction (mirrors nflows MaskedLinear._get_mask_and_degrees)
# ---------------------------------------------------------------------------
def _get_input_degrees(in_features):
    return jnp.arange(1, in_features + 1, dtype=jnp.int32)


def _hidden_degrees(out_features, autoregressive_features):
    max_ = max(1, autoregressive_features - 1)
    min_ = min(1, autoregressive_features - 1)
    return jnp.arange(out_features, dtype=jnp.int32) % max_ + min_


def _hidden_mask(in_degrees, out_features, autoregressive_features):
    out_degrees = _hidden_degrees(out_features, autoregressive_features)
    mask = (out_degrees[:, None] >= in_degrees[None, :]).astype(jnp.float32)
    return mask, out_degrees


def _output_mask(in_degrees, out_features, autoregressive_features, output_multiplier):
    # torchutils.tile(arange(1..F), M) repeats each degree M consecutive times.
    out_degrees = jnp.repeat(
        _get_input_degrees(autoregressive_features), output_multiplier
    )
    mask = (out_degrees[:, None] > in_degrees[None, :]).astype(jnp.float32)
    return mask, out_degrees


# ---------------------------------------------------------------------------
# Pallas kernel: initial masked linear + num_blocks residual blocks + final
# ---------------------------------------------------------------------------
def made_kernel(x_ref, w0_ref, wres_ref, wf_ref, b_ref, o_ref, *,
                num_blocks, hidden_pad, out_pad):
    f32 = jnp.float32
    cdt = w0_ref.dtype          # matmul-operand dtype (bf16 by default)

    # initial masked linear (bf16 operands, f32 MXU accumulation)
    temps = jnp.dot(x_ref[...], w0_ref[...], preferred_element_type=f32)
    temps = temps + b_ref[0:1, :hidden_pad]

    # residual blocks: relu -> masked linear -> relu -> masked linear -> add
    for blk in range(num_blocks):
        h = jnp.maximum(temps, 0.0)
        h = jnp.dot(h.astype(cdt), wres_ref[2 * blk], preferred_element_type=f32)
        h = h + b_ref[1 + 2 * blk: 2 + 2 * blk, :hidden_pad]
        h = jnp.maximum(h, 0.0)
        h = jnp.dot(h.astype(cdt), wres_ref[2 * blk + 1], preferred_element_type=f32)
        h = h + b_ref[2 + 2 * blk: 3 + 2 * blk, :hidden_pad]
        temps = temps + h

    # final masked linear
    out = jnp.dot(temps.astype(cdt), wf_ref[...], preferred_element_type=f32)
    out = out + b_ref[1 + 2 * num_blocks: 2 + 2 * num_blocks, :out_pad]
    o_ref[...] = out.astype(o_ref.dtype)


# ---------------------------------------------------------------------------
# Wrapper
# ---------------------------------------------------------------------------
def made_forward(x, params, *, tile_b=None):
    """x: (B, features). params: dict from build_made_params (padded, pre-masked)."""
    w0, wres, wf, biases = params["w0"], params["wres"], params["wf"], params["biases"]
    B, F = x.shape
    Fp, Hp = w0.shape
    OUTp = wf.shape[1]
    num_blocks = wres.shape[0] // 2
    out_features = params["out_features"]
    cdt = w0.dtype
    itemsize = jnp.dtype(cdt).itemsize
    row_align = 16 if itemsize == 2 else 8      # bf16 sublane packing needs 16 rows

    # --- batch tile selection with explicit VMEM budgeting -------------------
    if tile_b is None:
        tile_b = 512
    tile_b = min(tile_b, _round_up(B, row_align))
    tile_b = max(row_align, _round_up(tile_b, row_align))

    def vmem_estimate(tb):
        weights = (w0.size + wres.size + wf.size) * itemsize    # single-buffered
        bias_b = biases.size * 4
        x_buf = 2 * tb * Fp * itemsize                          # double-buffered input
        o_buf = 2 * tb * OUTp * 4                               # double-buffered output
        live = 3 * tb * max(Hp, OUTp) * 4                       # temps + h + dot result
        return weights + bias_b + x_buf + o_buf + live

    budget = 48 * 1024 * 1024   # stays under v7x's 64 MiB physical VMEM per core
    while vmem_estimate(tile_b) > budget and tile_b > row_align:
        tile_b = max(row_align, _round_up(tile_b // 2, row_align))
    est = vmem_estimate(tile_b)
    assert est <= budget, "MADE weights alone exceed the per-core VMEM budget"

    Bp = _round_up(B, tile_b)
    grid = (Bp // tile_b,)
    x_p = jnp.pad(x.astype(cdt), ((0, Bp - B), (0, Fp - F)))

    flops = 2 * Bp * (Fp * Hp + 2 * num_blocks * Hp * Hp + Hp * OUTp)
    bytes_accessed = (x_p.size * itemsize
                      + (w0.size + wres.size + wf.size) * itemsize
                      + biases.size * 4
                      + Bp * OUTp * 4)

    kernel = functools.partial(made_kernel, num_blocks=num_blocks,
                               hidden_pad=Hp, out_pad=OUTp)

    def build_and_run(single_buffer_weights):
        if single_buffer_weights:
            # Constant operands never change across the grid -> one VMEM copy.
            def const_spec(arr):
                nd = arr.ndim
                return pl.BlockSpec(arr.shape, lambda *_: (0,) * nd,
                                    pipeline_mode=pl.Buffered(1))
        else:
            # Fallback: whole-array VMEM-resident operands (no windowing).
            def const_spec(arr):
                return pl.BlockSpec(memory_space=pltpu.MemorySpace.VMEM)

        return pl.pallas_call(
            kernel,
            out_shape=jax.ShapeDtypeStruct((Bp, OUTp), jnp.float32),
            grid_spec=pltpu.PrefetchScalarGridSpec(
                num_scalar_prefetch=0,
                grid=grid,
                in_specs=[
                    pl.BlockSpec((tile_b, Fp), lambda i: (i, 0)),
                    const_spec(w0), const_spec(wres),
                    const_spec(wf), const_spec(biases),
                ],
                out_specs=pl.BlockSpec((tile_b, OUTp), lambda i: (i, 0)),
            ),
            compiler_params=pltpu.CompilerParams(
                dimension_semantics=("parallel",),   # shards batch grid over v7x's 2 TCs
                vmem_limit_bytes=int(min(64 * 1024 * 1024,
                                         max(32 * 1024 * 1024, 2 * est))),
            ),
            cost_estimate=pl.CostEstimate(flops=flops, transcendentals=0,
                                          bytes_accessed=bytes_accessed),
        )(x_p, w0, wres, wf, biases)

    try:
        out = build_and_run(single_buffer_weights=True)
    except Exception:
        # pl.Buffered(1) not supported by this backend -> VMEM-resident constants.
        out = build_and_run(single_buffer_weights=False)

    return out[:B, :out_features]


# ---------------------------------------------------------------------------
# Parameter construction (deterministic, synthetic init; pre-masked + padded)
# ---------------------------------------------------------------------------
def build_made_params(key, features, hidden_features, *, output_multiplier=1,
                      num_blocks=2, compute_dtype=jnp.bfloat16):
    f32 = jnp.float32
    F, H = features, hidden_features
    OUT = F * output_multiplier
    Fp, Hp, OUTp = _round_up(F, 128), _round_up(H, 128), _round_up(OUT, 128)
    WMAX = max(Hp, OUTp)

    in_deg = _get_input_degrees(F)
    mask0, deg_h = _hidden_mask(in_deg, H, F)                    # (H, F)
    mask_hh, _ = _hidden_mask(deg_h, H, F)                       # (H, H)
    mask_f, _ = _output_mask(deg_h, OUT, F, output_multiplier)   # (OUT, H)

    keys = jax.random.split(key, 2 + 2 * num_blocks)

    def lin(k, out_f, in_f, scale):
        kw, kb = jax.random.split(k)
        w = jax.random.uniform(kw, (out_f, in_f), f32, -scale, scale)
        b = jax.random.uniform(kb, (out_f,), f32, -scale, scale)
        return w, b

    def pad_weight(w, mask, in_pad, out_pad):
        wm = (w * mask).T                                        # pre-masked, (in, out)
        full = jnp.zeros((in_pad, out_pad), f32)
        full = full.at[: wm.shape[0], : wm.shape[1]].set(wm)
        return full.astype(compute_dtype)                        # exact zeros stay zero

    def pad_bias(b):
        return jnp.zeros((WMAX,), f32).at[: b.shape[0]].set(b)

    w0, b0 = lin(keys[0], H, F, 1.0 / (F ** 0.5))
    res_w, res_b = [], []
    for i in range(num_blocks):
        wa, ba = lin(keys[1 + 2 * i], H, H, 1.0 / (H ** 0.5))
        wb, bb = lin(keys[2 + 2 * i], H, H, 1e-3)                # zero_initialization
        res_w += [pad_weight(wa, mask_hh, Hp, Hp), pad_weight(wb, mask_hh, Hp, Hp)]
        res_b += [pad_bias(ba), pad_bias(bb)]
    wf, bf = lin(keys[1 + 2 * num_blocks], OUT, H, 1.0 / (H ** 0.5))

    bias_rows = [pad_bias(b0)] + res_b + [pad_bias(bf)]
    n_rows = _round_up(len(bias_rows), 8)                        # sublane-aligned stack
    biases = jnp.zeros((n_rows, WMAX), f32).at[: len(bias_rows)].set(jnp.stack(bias_rows))

    return {
        "w0": pad_weight(w0, mask0, Fp, Hp),                     # (Fp, Hp)       bf16
        "wres": jnp.stack(res_w),                                # (2*nb, Hp, Hp) bf16
        "wf": pad_weight(wf, mask_f, Hp, OUTp),                  # (Hp, OUTp)     bf16
        "biases": biases,                                        # (rows, WMAX)   f32
        "features": F,
        "out_features": OUT,
    }


# ---------------------------------------------------------------------------
# Pure-JAX reference (same padded bf16 weights, f32 accumulation)
# ---------------------------------------------------------------------------
def made_reference(x, params):
    f32 = jnp.float32
    w0, wres, wf, biases = params["w0"], params["wres"], params["wf"], params["biases"]
    cdt = w0.dtype
    Fp, Hp = w0.shape
    OUTp = wf.shape[1]
    nb = wres.shape[0] // 2
    B, F = x.shape
    x_p = jnp.pad(x.astype(cdt), ((0, 0), (0, Fp - F)))

    t = jnp.dot(x_p, w0, preferred_element_type=f32) + biases[0, :Hp]
    for i in range(nb):
        h = jnp.maximum(t, 0.0)
        h = jnp.dot(h.astype(cdt), wres[2 * i], preferred_element_type=f32) + biases[1 + 2 * i, :Hp]
        h = jnp.maximum(h, 0.0)
        h = jnp.dot(h.astype(cdt), wres[2 * i + 1], preferred_element_type=f32) + biases[2 + 2 * i, :Hp]
        t = t + h
    out = jnp.dot(t.astype(cdt), wf, preferred_element_type=f32) + biases[1 + 2 * nb, :OUTp]
    return out[:, : params["out_features"]]


if __name__ == "__main__":
    # TODO(synk): context_features / batch-norm / dropout>0 / random_mask paths of
    # the original module are not exercised (disabled in the default MADE config).
    features = 16
    hidden_features = 32
    output_multiplier = 1
    num_blocks = 2
    batch = 256          # with tile_b=128 -> grid=(2,), engages both v7x TensorCores

    key = jax.random.PRNGKey(0)
    kx, kp = jax.random.split(key)
    x = jax.random.normal(kx, (batch, features), dtype=jnp.float32)
    params = build_made_params(kp, features, hidden_features,
                               output_multiplier=output_multiplier,
                               num_blocks=num_blocks)

    out = made_forward(x, params, tile_b=128)
    out = jax.block_until_ready(out)

    ref = made_reference(x, params)
    assert out.shape == (batch, features * output_multiplier)
    assert jnp.allclose(out, ref, atol=5e-3, rtol=5e-3), "mismatch vs reference"

    print("KERNEL_OK")
</pallas_src>

<mosaic_0001>
module attributes {stable_mosaic.version = 11 : i64} {
  func.func @made_kernel(%arg0: i32, %arg1: memref<128x128xbf16, #tpu.memory_space<vmem>>, %arg2: memref<128x128xbf16, #tpu.memory_space<vmem>>, %arg3: memref<4x128x128xbf16, #tpu.memory_space<vmem>>, %arg4: memref<128x128xbf16, #tpu.memory_space<vmem>>, %arg5: memref<8x128xf32, #tpu.memory_space<vmem>>, %arg6: memref<128x128xf32, #tpu.memory_space<vmem>>) attributes {dimension_semantics = [#tpu.dimension_semantics<parallel>], iteration_bounds = array<i64: 2>, scalar_prefetch = 0 : i64, scratch_operands = 0 : i64, tpu.core_type = #tpu.core_type<tc>, window_params = [{transform_indices = @transform_0, window_bounds = array<i64: 128, 128>}, {pipeline_mode = #tpu.pipeline_mode<synchronous>, transform_indices = @transform_1, window_bounds = array<i64: 128, 128>}, {pipeline_mode = #tpu.pipeline_mode<synchronous>, transform_indices = @transform_2, window_bounds = array<i64: 4, 128, 128>}, {pipeline_mode = #tpu.pipeline_mode<synchronous>, transform_indices = @transform_3, window_bounds = array<i64: 128, 128>}, {pipeline_mode = #tpu.pipeline_mode<synchronous>, transform_indices = @transform_4, window_bounds = array<i64: 8, 128>}, {transform_indices = @transform_5, window_bounds = array<i64: 128, 128>}]} {
    %c0 = arith.constant 0 : index
    %c0_0 = arith.constant 0 : index
    %0 = vector.load %arg1[%c0, %c0_0] : memref<128x128xbf16, #tpu.memory_space<vmem>>, vector<128x128xbf16>
    %c0_1 = arith.constant 0 : index
    %c0_2 = arith.constant 0 : index
    %1 = vector.load %arg2[%c0_1, %c0_2] : memref<128x128xbf16, #tpu.memory_space<vmem>>, vector<128x128xbf16>
    %cst = arith.constant dense<0.000000e+00> : vector<128x128xf32>
    %2 = tpu.matmul %0, %1, %cst {dimension_numbers = #tpu.dot_dimension_numbers<[1], [0], [0], [1], [0, 0, 1, 1], [], []>} : vector<128x128xbf16>, vector<128x128xbf16>, vector<128x128xf32> -> vector<128x128xf32>
    %c0_3 = arith.constant 0 : index
    %c0_4 = arith.constant 0 : index
    %3 = vector.load %arg5[%c0_3, %c0_4] : memref<8x128xf32, #tpu.memory_space<vmem>>, vector<1x128xf32>
    %4 = vector.broadcast %3 : vector<1x128xf32> to vector<128x128xf32>
    %5 = arith.addf %2, %4 : vector<128x128xf32>
    %cst_5 = arith.constant 0.000000e+00 : f32
    %6 = vector.broadcast %cst_5 : f32 to vector<128x128xf32>
    %7 = arith.maximumf %5, %6 : vector<128x128xf32>
    %8 = arith.truncf %7 : vector<128x128xf32> to vector<128x128xbf16>
    %c0_6 = arith.constant 0 : index
    %c0_7 = arith.constant 0 : index
    %c0_8 = arith.constant 0 : index
    %9 = vector.load %arg3[%c0_6, %c0_7, %c0_8] : memref<4x128x128xbf16, #tpu.memory_space<vmem>>, vector<1x128x128xbf16>
    %10 = vector.shape_cast %9 : vector<1x128x128xbf16> to vector<128x128xbf16>
    %cst_9 = arith.constant dense<0.000000e+00> : vector<128x128xf32>
    %11 = tpu.matmul %8, %10, %cst_9 {dimension_numbers = #tpu.dot_dimension_numbers<[1], [0], [0], [1], [0, 0, 1, 1], [], []>} : vector<128x128xbf16>, vector<128x128xbf16>, vector<128x128xf32> -> vector<128x128xf32>
    %c1 = arith.constant 1 : index
    %c0_10 = arith.constant 0 : index
    %12 = vector.load %arg5[%c1, %c0_10] : memref<8x128xf32, #tpu.memory_space<vmem>>, vector<1x128xf32>
    %13 = vector.broadcast %12 : vector<1x128xf32> to vector<128x128xf32>
    %14 = arith.addf %11, %13 : vector<128x128xf32>
    %cst_11 = arith.constant 0.000000e+00 : f32
    %15 = vector.broadcast %cst_11 : f32 to vector<128x128xf32>
    %16 = arith.maximumf %14, %15 : vector<128x128xf32>
    %17 = arith.truncf %16 : vector<128x128xf32> to vector<128x128xbf16>
    %c1_12 = arith.constant 1 : index
    %c0_13 = arith.constant 0 : index
    %c0_14 = arith.constant 0 : index
    %18 = vector.load %arg3[%c1_12, %c0_13, %c0_14] : memref<4x128x128xbf16, #tpu.memory_space<vmem>>, vector<1x128x128xbf16>
    %19 = vector.shape_cast %18 : vector<1x128x128xbf16> to vector<128x128xbf16>
    %cst_15 = arith.constant dense<0.000000e+00> : vector<128x128xf32>
    %20 = tpu.matmul %17, %19, %cst_15 {dimension_numbers = #tpu.dot_dimension_numbers<[1], [0], [0], [1], [0, 0, 1, 1], [], []>} : vector<128x128xbf16>, vector<128x128xbf16>, vector<128x128xf32> -> vector<128x128xf32>
    %c2 = arith.constant 2 : index
    %c0_16 = arith.constant 0 : index
    %21 = vector.load %arg5[%c2, %c0_16] : memref<8x128xf32, #tpu.memory_space<vmem>>, vector<1x128xf32>
    %22 = vector.broadcast %21 : vector<1x128xf32> to vector<128x128xf32>
    %23 = arith.addf %20, %22 : vector<128x128xf32>
    %24 = arith.addf %5, %23 : vector<128x128xf32>
    %cst_17 = arith.constant 0.000000e+00 : f32
    %25 = vector.broadcast %cst_17 : f32 to vector<128x128xf32>
    %26 = arith.maximumf %24, %25 : vector<128x128xf32>
    %27 = arith.truncf %26 : vector<128x128xf32> to vector<128x128xbf16>
    %c2_18 = arith.constant 2 : index
    %c0_19 = arith.constant 0 : index
    %c0_20 = arith.constant 0 : index
    %28 = vector.load %arg3[%c2_18, %c0_19, %c0_20] : memref<4x128x128xbf16, #tpu.memory_space<vmem>>, vector<1x128x128xbf16>
    %29 = vector.shape_cast %28 : vector<1x128x128xbf16> to vector<128x128xbf16>
    %cst_21 = arith.constant dense<0.000000e+00> : vector<128x128xf32>
    %30 = tpu.matmul %27, %29, %cst_21 {dimension_numbers = #tpu.dot_dimension_numbers<[1], [0], [0], [1], [0, 0, 1, 1], [], []>} : vector<128x128xbf16>, vector<128x128xbf16>, vector<128x128xf32> -> vector<128x128xf32>
    %c3 = arith.constant 3 : index
    %c0_22 = arith.constant 0 : index
    %31 = vector.load %arg5[%c3, %c0_22] : memref<8x128xf32, #tpu.memory_space<vmem>>, vector<1x128xf32>
    %32 = vector.broadcast %31 : vector<1x128xf32> to vector<128x128xf32>
    %33 = arith.addf %30, %32 : vector<128x128xf32>
    %cst_23 = arith.constant 0.000000e+00 : f32
    %34 = vector.broadcast %cst_23 : f32 to vector<128x128xf32>
    %35 = arith.maximumf %33, %34 : vector<128x128xf32>
    %36 = arith.truncf %35 : vector<128x128xf32> to vector<128x128xbf16>
    %c3_24 = arith.constant 3 : index
    %c0_25 = arith.constant 0 : index
    %c0_26 = arith.constant 0 : index
    %37 = vector.load %arg3[%c3_24, %c0_25, %c0_26] : memref<4x128x128xbf16, #tpu.memory_space<vmem>>, vector<1x128x128xbf16>
    %38 = vector.shape_cast %37 : vector<1x128x128xbf16> to vector<128x128xbf16>
    %cst_27 = arith.constant dense<0.000000e+00> : vector<128x128xf32>
    %39 = tpu.matmul %36, %38, %cst_27 {dimension_numbers = #tpu.dot_dimension_numbers<[1], [0], [0], [1], [0, 0, 1, 1], [], []>} : vector<128x128xbf16>, vector<128x128xbf16>, vector<128x128xf32> -> vector<128x128xf32>
    %c4 = arith.constant 4 : index
    %c0_28 = arith.constant 0 : index
    %40 = vector.load %arg5[%c4, %c0_28] : memref<8x128xf32, #tpu.memory_space<vmem>>, vector<1x128xf32>
    %41 = vector.broadcast %40 : vector<1x128xf32> to vector<128x128xf32>
    %42 = arith.addf %39, %41 : vector<128x128xf32>
    %43 = arith.addf %24, %42 : vector<128x128xf32>
    %44 = arith.truncf %43 : vector<128x128xf32> to vector<128x128xbf16>
    %c0_29 = arith.constant 0 : index
    %c0_30 = arith.constant 0 : index
    %45 = vector.load %arg4[%c0_29, %c0_30] : memref<128x128xbf16, #tpu.memory_space<vmem>>, vector<128x128xbf16>
    %cst_31 = arith.constant dense<0.000000e+00> : vector<128x128xf32>
    %46 = tpu.matmul %44, %45, %cst_31 {dimension_numbers = #tpu.dot_dimension_numbers<[1], [0], [0], [1], [0, 0, 1, 1], [], []>} : vector<128x128xbf16>, vector<128x128xbf16>, vector<128x128xf32> -> vector<128x128xf32>
    %c5 = arith.constant 5 : index
    %c0_32 = arith.constant 0 : index
    %47 = vector.load %arg5[%c5, %c0_32] : memref<8x128xf32, #tpu.memory_space<vmem>>, vector<1x128xf32>
    %48 = vector.broadcast %47 : vector<1x128xf32> to vector<128x128xf32>
    %49 = arith.addf %46, %48 : vector<128x128xf32>
    %c0_33 = arith.constant 0 : index
    %c0_34 = arith.constant 0 : index
    %50 = vector.load %arg6[%c0_33, %c0_34] : memref<128x128xf32, #tpu.memory_space<vmem>>, vector<128x128xf32>
    tpu.vector_store %arg6[%c0_33, %c0_34], %49 {strides = array<i32>} : memref<128x128xf32, #tpu.memory_space<vmem>>, vector<128x128xf32>,
    return
  }
  func.func @transform_0(%arg0: i32) -> (i32, i32) {
    %c0_i32 = arith.constant 0 : i32
    %c0_i32_0 = arith.constant 0 : i32
    return %arg0, %c0_i32 : i32, i32
  }
  func.func @transform_1(%arg0: i32) -> (i32, i32) {
    %c0_i32 = arith.constant 0 : i32
    %c0_i32_0 = arith.constant 0 : i32
    %c0_i32_1 = arith.constant 0 : i32
    return %c0_i32, %c0_i32_0 : i32, i32
  }
  func.func @transform_2(%arg0: i32) -> (i32, i32, i32) {
    %c0_i32 = arith.constant 0 : i32
    %c0_i32_0 = arith.constant 0 : i32
    %c0_i32_1 = arith.constant 0 : i32
    %c0_i32_2 = arith.constant 0 : i32
    return %c0_i32, %c0_i32_0, %c0_i32_1 : i32, i32, i32
  }
  func.func @transform_3(%arg0: i32) -> (i32, i32) {
    %c0_i32 = arith.constant 0 : i32
    %c0_i32_0 = arith.constant 0 : i32
    %c0_i32_1 = arith.constant 0 : i32
    return %c0_i32, %c0_i32_0 : i32, i32
  }
  func.func @transform_4(%arg0: i32) -> (i32, i32) {
    %c0_i32 = arith.constant 0 : i32
    %c0_i32_0 = arith.constant 0 : i32
    %c0_i32_1 = arith.constant 0 : i32
    return %c0_i32, %c0_i32_0 : i32, i32
  }
  func.func @transform_5(%arg0: i32) -> (i32, i32) {
    %c0_i32 = arith.constant 0 : i32
    %c0_i32_0 = arith.constant 0 : i32
    return %arg0, %c0_i32 : i32, i32
  }
}

module attributes {stable_mosaic.version = 11 : i64} {
  func.func @made_kernel(%arg0: i32, %arg1: memref<128x128xbf16, #tpu.memory_space<vmem>>, %arg2: memref<128x128xbf16, #tpu.memory_space<vmem>>, %arg3: memref<4x128x128xbf16, #tpu.memory_space<vmem>>, %arg4: memref<128x128xbf16, #tpu.memory_space<vmem>>, %arg5: memref<8x128xf32, #tpu.memory_space<vmem>>, %arg6: memref<128x128xf32, #tpu.memory_space<vmem>>) attributes {dimension_semantics = [#tpu.dimension_semantics<parallel>], iteration_bounds = array<i64: 2>, scalar_prefetch = 0 : i64, scratch_operands = 0 : i64, tpu.core_type = #tpu.core_type<tc>, window_params = [{transform_indices = @transform_0, window_bounds = array<i64: 128, 128>}, {pipeline_mode = #tpu.pipeline_mode<synchronous>, transform_indices = @transform_1, window_bounds = array<i64: 128, 128>}, {pipeline_mode = #tpu.pipeline_mode<synchronous>, transform_indices = @transform_2, window_bounds = array<i64: 4, 128, 128>}, {pipeline_mode = #tpu.pipeline_mode<synchronous>, transform_indices = @transform_3, window_bounds = array<i64: 128, 128>}, {pipeline_mode = #tpu.pipeline_mode<synchronous>, transform_indices = @transform_4, window_bounds = array<i64: 8, 128>}, {transform_indices = @transform_5, window_bounds = array<i64: 128, 128>}]} {
    %c0 = arith.constant 0 : index
    %c0_0 = arith.constant 0 : index
    %0 = vector.load %arg1[%c0, %c0_0] : memref<128x128xbf16, #tpu.memory_space<vmem>>, vector<128x128xbf16>
    %c0_1 = arith.constant 0 : index
    %c0_2 = arith.constant 0 : index
    %1 = vector.load %arg2[%c0_1, %c0_2] : memref<128x128xbf16, #tpu.memory_space<vmem>>, vector<128x128xbf16>
    %cst = arith.constant dense<0.000000e+00> : vector<128x128xf32>
    %2 = tpu.matmul %0, %1, %cst {dimension_numbers = #tpu.dot_dimension_numbers<[1], [0], [0], [1], [0, 0, 1, 1], [], []>} : vector<128x128xbf16>, vector<128x128xbf16>, vector<128x128xf32> -> vector<128x128xf32>
    %c0_3 = arith.constant 0 : index
    %c0_4 = arith.constant 0 : index
    %3 = vector.load %arg5[%c0_3, %c0_4] : memref<8x128xf32, #tpu.memory_space<vmem>>, vector<1x128xf32>
    %4 = vector.broadcast %3 : vector<1x128xf32> to vector<128x128xf32>
    %5 = arith.addf %2, %4 : vector<128x128xf32>
    %cst_5 = arith.constant 0.000000e+00 : f32
    %6 = vector.broadcast %cst_5 : f32 to vector<128x128xf32>
    %7 = arith.maximumf %5, %6 : vector<128x128xf32>
    %8 = arith.truncf %7 : vector<128x128xf32> to vector<128x128xbf16>
    %c0_6 = arith.constant 0 : index
    %c0_7 = arith.constant 0 : index
    %c0_8 = arith.constant 0 : index
    %9 = vector.load %arg3[%c0_6, %c0_7, %c0_8] : memref<4x128x128xbf16, #tpu.memory_space<vmem>>, vector<1x128x128xbf16>
    %10 = vector.shape_cast %9 : vector<1x128x128xbf16> to vector<128x128xbf16>
    %cst_9 = arith.constant dense<0.000000e+00> : vector<128x128xf32>
    %11 = tpu.matmul %8, %10, %cst_9 {dimension_numbers = #tpu.dot_dimension_numbers<[1], [0], [0], [1], [0, 0, 1, 1], [], []>} : vector<128x128xbf16>, vector<128x128xbf16>, vector<128x128xf32> -> vector<128x128xf32>
    %c1 = arith.constant 1 : index
    %c0_10 = arith.constant 0 : index
    %12 = vector.load %arg5[%c1, %c0_10] : memref<8x128xf32, #tpu.memory_space<vmem>>, vector<1x128xf32>
    %13 = vector.broadcast %12 : vector<1x128xf32> to vector<128x128xf32>
    %14 = arith.addf %11, %13 : vector<128x128xf32>
    %cst_11 = arith.constant 0.000000e+00 : f32
    %15 = vector.broadcast %cst_11 : f32 to vector<128x128xf32>
    %16 = arith.maximumf %14, %15 : vector<128x128xf32>
    %17 = arith.truncf %16 : vector<128x128xf32> to vector<128x128xbf16>
    %c1_12 = arith.constant 1 : index
    %c0_13 = arith.constant 0 : index
    %c0_14 = arith.constant 0 : index
    %18 = vector.load %arg3[%c1_12, %c0_13, %c0_14] : memref<4x128x128xbf16, #tpu.memory_space<vmem>>, vector<1x128x128xbf16>
    %19 = vector.shape_cast %18 : vector<1x128x128xbf16> to vector<128x128xbf16>
    %cst_15 = arith.constant dense<0.000000e+00> : vector<128x128xf32>
    %20 = tpu.matmul %17, %19, %cst_15 {dimension_numbers = #tpu.dot_dimension_numbers<[1], [0], [0], [1], [0, 0, 1, 1], [], []>} : vector<128x128xbf16>, vector<128x128xbf16>, vector<128x128xf32> -> vector<128x128xf32>
    %c2 = arith.constant 2 : index
    %c0_16 = arith.constant 0 : index
    %21 = vector.load %arg5[%c2, %c0_16] : memref<8x128xf32, #tpu.memory_space<vmem>>, vector<1x128xf32>
    %22 = vector.broadcast %21 : vector<1x128xf32> to vector<128x128xf32>
    %23 = arith.addf %20, %22 : vector<128x128xf32>
    %24 = arith.addf %5, %23 : vector<128x128xf32>
    %cst_17 = arith.constant 0.000000e+00 : f32
    %25 = vector.broadcast %cst_17 : f32 to vector<128x128xf32>
    %26 = arith.maximumf %24, %25 : vector<128x128xf32>
    %27 = arith.truncf %26 : vector<128x128xf32> to vector<128x128xbf16>
    %c2_18 = arith.constant 2 : index
    %c0_19 = arith.constant 0 : index
    %c0_20 = arith.constant 0 : index
    %28 = vector.load %arg3[%c2_18, %c0_19, %c0_20] : memref<4x128x128xbf16, #tpu.memory_space<vmem>>, vector<1x128x128xbf16>
    %29 = vector.shape_cast %28 : vector<1x128x128xbf16> to vector<128x128xbf16>
    %cst_21 = arith.constant dense<0.000000e+00> : vector<128x128xf32>
    %30 = tpu.matmul %27, %29, %cst_21 {dimension_numbers = #tpu.dot_dimension_numbers<[1], [0], [0], [1], [0, 0, 1, 1], [], []>} : vector<128x128xbf16>, vector<128x128xbf16>, vector<128x128xf32> -> vector<128x128xf32>
    %c3 = arith.constant 3 : index
    %c0_22 = arith.constant 0 : index
    %31 = vector.load %arg5[%c3, %c0_22] : memref<8x128xf32, #tpu.memory_space<vmem>>, vector<1x128xf32>
    %32 = vector.broadcast %31 : vector<1x128xf32> to vector<128x128xf32>
    %33 = arith.addf %30, %32 : vector<128x128xf32>
    %cst_23 = arith.constant 0.000000e+00 : f32
    %34 = vector.broadcast %cst_23 : f32 to vector<128x128xf32>
    %35 = arith.maximumf %33, %34 : vector<128x128xf32>
    %36 = arith.truncf %35 : vector<128x128xf32> to vector<128x128xbf16>
    %c3_24 = arith.constant 3 : index
    %c0_25 = arith.constant 0 : index
    %c0_26 = arith.constant 0 : index
    %37 = vector.load %arg3[%c3_24, %c0_25, %c0_26] : memref<4x128x128xbf16, #tpu.memory_space<vmem>>, vector<1x128x128xbf16>
    %38 = vector.shape_cast %37 : vector<1x128x128xbf16> to vector<128x128xbf16>
    %cst_27 = arith.constant dense<0.000000e+00> : vector<128x128xf32>
    %39 = tpu.matmul %36, %38, %cst_27 {dimension_numbers = #tpu.dot_dimension_numbers<[1], [0], [0], [1], [0, 0, 1, 1], [], []>} : vector<128x128xbf16>, vector<128x128xbf16>, vector<128x128xf32> -> vector<128x128xf32>
    %c4 = arith.constant 4 : index
    %c0_28 = arith.constant 0 : index
    %40 = vector.load %arg5[%c4, %c0_28] : memref<8x128xf32, #tpu.memory_space<vmem>>, vector<1x128xf32>
    %41 = vector.broadcast %40 : vector<1x128xf32> to vector<128x128xf32>
    %42 = arith.addf %39, %41 : vector<128x128xf32>
    %43 = arith.addf %24, %42 : vector<128x128xf32>
    %44 = arith.truncf %43 : vector<128x128xf32> to vector<128x128xbf16>
    %c0_29 = arith.constant 0 : index
    %c0_30 = arith.constant 0 : index
    %45 = vector.load %arg4[%c0_29, %c0_30] : memref<128x128xbf16, #tpu.memory_space<vmem>>, vector<128x128xbf16>
    %cst_31 = arith.constant dense<0.000000e+00> : vector<128x128xf32>
    %46 = tpu.matmul %44, %45, %cst_31 {dimension_numbers = #tpu.dot_dimension_numbers<[1], [0], [0], [1], [0, 0, 1, 1], [], []>} : vector<128x128xbf16>, vector<128x128xbf16>, vector<128x128xf32> -> vector<128x128xf32>
    %c5 = arith.constant 5 : index
    %c0_32 = arith.constant 0 : index
    %47 = vector.load %arg5[%c5, %c0_32] : memref<8x128xf32, #tpu.memory_space<vmem>>, vector<1x128xf32>
    %48 = vector.broadcast %47 : vector<1x128xf32> to vector<128x128xf32>
    %49 = arith.addf %46, %48 : vector<128x128xf32>
    %c0_33 = arith.constant 0 : index
    %c0_34 = arith.constant 0 : index
    %50 = vector.load %arg6[%c0_33, %c0_34] : memref<128x128xf32, #tpu.memory_space<vmem>>, vector<128x128xf32>
    tpu.vector_store %arg6[%c0_33, %c0_34], %49 {strides = array<i32>} : memref<128x128xf32, #tpu.memory_space<vmem>>, vector<128x128xf32>,
    return
  }
  func.func @transform_0(%arg0: i32) -> (i32, i32) {
    %c0_i32 = arith.constant 0 : i32
    %c0_i32_0 = arith.constant 0 : i32
    return %arg0, %c0_i32 : i32, i32
  }
  func.func @transform_1(%arg0: i32) -> (i32, i32) {
    %c0_i32 = arith.constant 0 : i32
    %c0_i32_0 = arith.constant 0 : i32
    %c0_i32_1 = arith.constant 0 : i32
    return %c0_i32, %c0_i32_0 : i32, i32
  }
  func.func @transform_2(%arg0: i32) -> (i32, i32, i32) {
    %c0_i32 = arith.constant 0 : i32
    %c0_i32_0 = arith.constant 0 : i32
    %c0_i32_1 = arith.constant 0 : i32
    %c0_i32_2 = arith.constant 0 : i32
    return %c0_i32, %c0_i32_0, %c0_i32_1 : i32, i32, i32
  }
  func.func @transform_3(%arg0: i32) -> (i32, i32) {
    %c0_i32 = arith.constant 0 : i32
    %c0_i32_0 = arith.constant 0 : i32
    %c0_i32_1 = arith.constant 0 : i32
    return %c0_i32, %c0_i32_0 : i32, i32
  }
  func.func @transform_4(%arg0: i32) -> (i32, i32) {
    %c0_i32 = arith.constant 0 : i32
    %c0_i32_0 = arith.constant 0 : i32
    %c0_i32_1 = arith.constant 0 : i32
    return %c0_i32, %c0_i32_0 : i32, i32
  }
  func.func @transform_5(%arg0: i32) -> (i32, i32) {
    %c0_i32 = arith.constant 0 : i32
    %c0_i32_0 = arith.constant 0 : i32
    return %arg0, %c0_i32 : i32, i32
  }
}

</mosaic_0001>

<bundles_post_ra>
// kernel: tpu_custom_call.1
= control target key start
LH: loop header
LB: loop body
LE: loop exit
PB: predicated region body
PF: predicated region fallthrough
CT: control target
= control target key end

     0   :  { %10 = vsyncpa [#allocation3], 0  ;;  %s2824_s0 = inlined_call_operand.hbm [shape: bf16[256,128], index: 0, kind: input, shape index: {}]   ;;  %s2825_s1 = inlined_call_operand.hbm [shape: bf16[128,128], index: 1, kind: input, shape index: {}]   ;;  %s2826_s2 = inlined_call_operand.hbm [shape: bf16[4,128,128], index: 2, kind: input, shape index: {}]   ;;  %s2827_s3 = inlined_call_operand.hbm [shape: bf16[128,128], index: 3, kind: input, shape index: {}]   ;;  %s2828_s4 = inlined_call_operand.vmem [shape: f32[8,128], index: 4, kind: input, shape index: {}]   ;;  %s2829_s5 = inlined_call_operand.hbm [shape: f32[256,128], index: 5, kind: output, shape index: {}]  }
   0x1   :  { %12 = vsyncpa [#allocation3 + $0x1], 0 }
   0x2   :  { %13 = vsyncpa [#allocation6], 0 }
   0x3   :  { %14 = vsyncpa [#allocation9], 0 }
   0x4   :  { %15 = vsyncpa [#allocation4], 0 }
   0x5   :  { %17 = vsyncpa [#allocation4 + $0x1], 0  ;;  %s2359_s18 = smov 0   ;;  %s2361_s19 = smov 0  }
   0x6   :  { %s2363_s20 = smov 0   ;;  %s2365_s21 = smov 0  }
   0x7 LB: > { %s2380_s22 = sadd.s32 4294967295, %s2318_s21   ;;  %s1621_s23 = sadd.s32 4294967294, %s2318_s21   ;;  %s2318_s21 = sphi %s2365_s21, %s2852_s21   ;;  %s2314_s20 = sphi %s2363_s20, %s2851_s20   ;;  %s2310_s19 = sphi %s2361_s19, %s2850_s19   ;;  %s2306_s18 = sphi %s2359_s18, %s2849_s18  }
   0x8   : > { %p43_p0 = scmp.ne.s32.totalorder %s2310_s19, %s2306_s18  ;;  %p2830_p1 = scmp.eq.s32.totalorder %s2380_s22, 0 }
   0x9   : > { %p157_p3 = scmp.eq.s32.totalorder %s1621_s23, 1  ;;  %p1622_p5 = scmp.ge.s32.totalorder %s2318_s21, 1 }
   0xa   : > { %p2389_p4 = por %p2830_p1, %p43_p0  ;;  %p164_p7 = scmp.lt.s32.totalorder %s2318_s21, 3 }
   0xb   : > { %p2394_p6 = por %p157_p3, %p43_p0  ;;  %s2320_s27 = smov [#allocation5]  }
   0xc   : > { %s2833_s24 = scalar_select %p2389_p4, 1, 0 }
   0xd   : > { %s2834_s25 = scalar_select %p2394_p6, 1, 0 }
   0xe   : > { %p2399_p8 = pnand %p1622_p5, %p164_p7  ;;  %s176_s28 = sshll.u32 %s2320_s27, 4  ;;  %s2403_s28 = int_to_ptr.vmem [resolvable:$true] %s176_s28 }
   0xf   : > { %s2321_s30 = smov [#allocation7]   ;;  %s2322_s7 = smov [#allocation8]  }
  0x10   : > { %s2835_s26 = scalar_select %p2399_p8, 1, 0 }
  0x11   : > { %p2009_p9 = pneg %p2399_p8  ;;  %s189_s6 = sshll.u32 %s2321_s30, 4  ;;  %s2414_s6 = int_to_ptr.vmem [resolvable:$true] %s189_s6 }
  0x12   : > { %s2416_s8 = sshll.u32 %s2322_s7, 4  ;;  %s2130_s11 = scalar_lea.hbm %s2825_s1, 1024  ;;  %s203_s8 = int_to_ptr.vmem [resolvable:$true] %s2416_s8 }
  0x13   : > { %p2410_p11 = pnand %p2009_p9, %p2830_p1  ;;  %p2131_p12 = scmp.ne.s32.totalorder %s2825_s1, %s2130_s11 }
  0x14   : > { %p2137_p5 = scmp.lt.u32.totalorder %s2130_s11, %s2825_s1 }
  0x15   : > { %p2426_p13 = pneg %p2410_p11 }
  0x17   : > { %p2133_p0 = pnand %p2426_p13, %p2131_p12 }
  0x19   : > { %p2134_p3 = pneg %p2133_p0 }
  0x1b   : > { %p2139_p7 = pnand %p2137_p5, %p2134_p3 }
  0x1d   : > { %2142 = shalt.err (!%p2139_p7)
}
  0x1e   : > { %s2143_s17 = scalar_lea.vmem %s2403_s28, 1024  ;;  %p2151_p2 = scmp.lt.s32.totalorder %s2403_s28, %s2403_s28 }
  0x1f   : > { %p2144_p9 = scmp.ne.s32.totalorder %s2403_s28, %s2143_s17  ;;  %p2152_p6 = scmp.lt.s32.totalorder %s2143_s17, %s2143_s17 }
  0x21   : > { %p2146_p10 = pnand %p2144_p9, %p2426_p13  ;;  %p2153_p12 = por %p2152_p6, %p2151_p2 }
  0x23   : > { %p2147_p1 = pneg %p2146_p10 }
  0x25   : > { %p2154_p0 = pnand %p2153_p12, %p2147_p1 }
  0x27   : > { %2157 = shalt.err (!%p2154_p0)
}
  0x28   : > { %s2323_s23 = smov 64   ;;  %s2324_s27 = smov 4  }
  0x29   : > { %2012 = dma.hbm_to_vmem [thread:$0]  (!%p2410_p11), %s2825_s1, 1024, %s2403_s28, [#allocation6], %s2323_s23, %s2323_s23, %s2324_s27  }
  0x2a   : > { %s2158_s11 = scalar_lea.hbm %s2826_s2, 4096 }
  0x2b   : > { %p2159_p1 = scmp.ne.s32.totalorder %s2826_s2, %s2158_s11  ;;  %p2165_p10 = scmp.lt.u32.totalorder %s2158_s11, %s2826_s2 }
  0x2d   : > { %p2161_p2 = pnand %p2159_p1, %p2426_p13 }
  0x2f   : > { %p2162_p6 = pneg %p2161_p2 }
  0x31   : > { %p2167_p3 = pnand %p2165_p10, %p2162_p6 }
  0x33   : > { %2170 = shalt.err (!%p2167_p3)
}
  0x34   : > { %s2171_s28 = scalar_lea.vmem %s2414_s6, 4096  ;;  %p2179_p12 = scmp.lt.s32.totalorder %s2414_s6, %s2414_s6 }
  0x35   : > { %p2172_p5 = scmp.ne.s32.totalorder %s2414_s6, %s2171_s28  ;;  %p2180_p0 = scmp.lt.s32.totalorder %s2171_s28, %s2171_s28 }
  0x37   : > { %p2174_p7 = pnand %p2172_p5, %p2426_p13  ;;  %p2181_p1 = por %p2180_p0, %p2179_p12 }
  0x39   : > { %p2175_p9 = pneg %p2174_p7 }
  0x3b   : > { %p2182_p2 = pnand %p2181_p1, %p2175_p9 }
  0x3d   : > { %2185 = shalt.err (!%p2182_p2)
}
  0x3e   : > { %2015 = dma.hbm_to_vmem [thread:$0]  (!%p2410_p11), %s2826_s2, 4096, %s2414_s6, [#allocation6], %s2323_s23, %s2323_s23, %s2324_s27  }
  0x3f   : > { %s2186_s10 = scalar_lea.hbm %s2827_s3, 1024 }
  0x40   : > { %p2187_p6 = scmp.ne.s32.totalorder %s2827_s3, %s2186_s10  ;;  %p2193_p5 = scmp.lt.u32.totalorder %s2186_s10, %s2827_s3 }
  0x42   : > { %p2189_p10 = pnand %p2187_p6, %p2426_p13 }
  0x44   : > { %p2190_p3 = pneg %p2189_p10 }
  0x46   : > { %p2195_p7 = pnand %p2193_p5, %p2190_p3 }
  0x48   : > { %2198 = shalt.err (!%p2195_p7)
}
  0x49   : > { %s2199_s16 = scalar_lea.vmem %s203_s8, 1024  ;;  %p2207_p1 = scmp.lt.s32.totalorder %s203_s8, %s203_s8 }
  0x4a   : > { %p2200_p9 = scmp.ne.s32.totalorder %s203_s8, %s2199_s16  ;;  %p2208_p2 = scmp.lt.s32.totalorder %s2199_s16, %s2199_s16 }
  0x4c   : > { %p2202_p12 = pnand %p2200_p9, %p2426_p13  ;;  %p2209_p4 = por %p2208_p2, %p2207_p1 }
  0x4e   : > { %p2203_p0 = pneg %p2202_p12 }
  0x50   : > { %p2210_p8 = pnand %p2209_p4, %p2203_p0 }
  0x52   : > { %2213 = shalt.err (!%p2210_p8)
}
  0x53   : > { %2018 = dma.hbm_to_vmem [thread:$0]  (!%p2410_p11), %s2827_s3, 1024, %s203_s8, [#allocation9], %s2323_s23, %s2323_s23, %s2324_s27  }
  0x54   : > { %s2499_s14 = sadd.s32 1, %s2318_s21   ;;  %s30_s17 = sadd.s32 1, %s2314_s20 }
  0x55   : > { %s27_s29 = ssub.s32 %s2318_s21, %s2499_s14  ;;  %p37_p8 = scmp.ne.s32.totalorder %s2314_s20, %s2310_s19 }
  0x56   : > { %p28_p4 = scmp.eq.s32.totalorder %s27_s29, 0  ;;  %p38_p13 = scmp.eq.s32.totalorder %s2318_s21, 0 }
  0x57   : > { %p2030_p6 = scmp.lt.s32.totalorder %s2318_s21, 2  ;;  %p2838_p3 = scmp.eq.s32.totalorder %s2380_s22, 1 }
  0x58   : > { %s2509_s30 = scalar_select %p28_p4, %s2314_s20, %s30_s17  }
  0x59   : > { %p39_p10 = por %p38_p13, %p37_p8  ;;  %p2513_p5 = por %p2838_p3, %p37_p8 }
  0x5a   : > { %s219_s9 = sand.u32 1, %s2314_s20   ;;  %s1703_s10 = sshll.u32 %s2318_s21, 10 }
  0x5b   : > { %s1627_s8 = sshll.u32 %s219_s9, 6  ;;  %s2522_s13 = scalar_lea.hbm %s2824_s0, %s1703_s10 }
  0x5c   : > { %s223_s15 = scalar_lea.vmem [#allocation2], %s1627_s8  ;;  %p2524_p11 = pnand %p2030_p6, %p39_p10 }
  0x5d   : > { %s230_s16 = sshll.u32 %s223_s15, 4  ;;  %s2530_s28 = scalar_lea.sflag [#allocation3], %s219_s9  ;;  %s2528_s16 = int_to_ptr.vmem [resolvable:$true] %s230_s16 }
  0x5e   : > { %s2214_s29 = scalar_lea.hbm %s2522_s13, 1024  ;;  %p2216_p9 = pneg %p2524_p11 }
  0x5f   : > { %p2215_p7 = scmp.ne.s32.totalorder %s2522_s13, %s2214_s29  ;;  %s2219_s8 = scalar_lea.hbm %s2824_s0, 2048 }
  0x60   : > { %p2220_p1 = scmp.lt.u32.totalorder %s2522_s13, %s2824_s0  ;;  %p2221_p2 = scmp.lt.u32.totalorder %s2219_s8, %s2214_s29 }
  0x61   : > { %p2217_p12 = pnand %p2216_p9, %p2215_p7  ;;  %p2223_p8 = scmp.lt.u32.totalorder %s2214_s29, %s2522_s13 }
  0x62   : > { %p2222_p4 = por %p2221_p2, %p2220_p1 }
  0x63   : > { %p2218_p0 = pneg %p2217_p12 }
  0x64   : > { %p2224_p13 = por %p2223_p8, %p2222_p4 }
  0x66   : > { %p2225_p6 = pnand %p2224_p13, %p2218_p0 }
  0x68   : > { %2228 = shalt.err (!%p2225_p6)
}
  0x69   : > { %s2229_s9 = scalar_lea.vmem %s2528_s16, 1024  ;;  %s2325_s15 = smov [#allocation2]  }
  0x6a   : > { %p2230_p10 = scmp.ne.s32.totalorder %s2528_s16, %s2229_s9  ;;  %s2234_s17 = sshll.u32 %s2325_s15, 4  ;;  %s2235_s17 = int_to_ptr.vmem [resolvable:$false] %s2234_s17 }
  0x6b   : > { %s2236_s10 = scalar_lea.vmem %s2235_s17, 2048  ;;  %p2237_p12 = scmp.lt.s32.totalorder %s2528_s16, %s2235_s17 }
  0x6c   : > { %p2232_p3 = pnand %p2230_p10, %p2216_p9  ;;  %p2238_p1 = scmp.lt.s32.totalorder %s2236_s10, %s2229_s9 }
  0x6e   : > { %p2233_p7 = pneg %p2232_p3  ;;  %p2239_p2 = por %p2238_p1, %p2237_p12 }
  0x70   : > { %p2240_p4 = pnand %p2239_p2, %p2233_p7 }
  0x72   : > { %2243 = shalt.err (!%p2240_p4)
}
  0x73   : > { %2022 = dma.hbm_to_vmem [thread:$0]  (!%p2524_p11), %s2522_s13, 1024, %s2528_s16, %s2530_s28, %s2323_s23, %s2323_s23, %s2324_s27  }
  0x74   : > { %p2841_p9 = scmp.ne.s32.totalorder %s2835_s26, 0 }
  0x75   : > { %s2564_s29 = sand.u32 (!%p2841_p9), 1, %s2310_s19   ;;  %p2842_p0 = scmp.ne.s32.totalorder (!%p2841_p9), %s2833_s24, 0 }
  0x76   : > { %242 = sbr.rel (%p2841_p9) target bundleno = 1534 (0x5fe), region = 40  ;;  %s1631_s8 = sshll.u32 (!%p2841_p9), %s2564_s29, 6 }
  0x77   : > { %s245_s11 = scalar_lea.sflag (!%p2841_p9), [#allocation3], %s2564_s29  ;;  %s2568_s12 = scalar_lea.vmem (!%p2841_p9), [#allocation2], %s1631_s8 }
  0x7d   : > { %2289 = dma.done.wait (%p2842_p0), %s245_s11, 1024  }
  0x7e   : > { %2291 = vsyncadd (%p2842_p0), %s245_s11, 4294966272  ;;  %p2843_p11 = scmp.eq.s32.totalorder %s2380_s22, 0 }
  0x80   : > { %2293 = dma.done.wait (%p2843_p11), [#allocation6], 5120   ;;  %p2844_p8 = pmov %p2843_p11 }
  0x82   : > { %2295 = vsyncadd (%p2844_p8), [#allocation6], 4294962176  ;;  %p2845_p13 = pmov %p2844_p8 }
  0x83   : > { %p2846_p6 = pmov %p2844_p8 }
  0x84   : > { %2297 = dma.done.wait (%p2845_p13), [#allocation9], 1024  }
  0x85   : > { %2299 = vsyncadd (%p2846_p6), [#allocation9], 4294966272  ;;  %v2074_v0 = vld [vmem:[#allocation5] sm:$0xff]   ;;  %v2075_v1 = vld [vmem:[#allocation5 + $0x8] sm:$0xff]   ;;  %s1635_s17 = sshll.u32 %s2564_s29, 7  ;;  %s2326_s16 = smov [#allocation10]  }
  0x86   : > { %1801 = vmatprep.subr.bf16.mxu0 %v2074_v0  ;;  %v2076_v2 = vld [vmem:[#allocation5 + $0x10] sm:$0xff]   ;;  %v2077_v3 = vld [vmem:[#allocation5 + $0x18] sm:$0xff]   ;;  %v2082_v4 = vld [vmem:[%s2568_s12] sm:$0xff]   ;;  %s2755_s11 = scalar_lea.vmem [#allocation10], %s1635_s17  ;;  %s2248_s6 = sshll.u32 %s2326_s16, 4  ;;  %s2249_s6 = int_to_ptr.vmem [resolvable:$false] %s2248_s6 }
  0x87   : > { %1802 = vmatpush3.bf16.msra.mxu0 %v2074_v0  ;;  %1817 = vmatprep.mubr.bf16.mxu0 %v2082_v4  ;;  %v2078_v5 = vld [vmem:[#allocation5 + $0x20] sm:$0xff]   ;;  %v2079_v6 = vld [vmem:[#allocation5 + $0x28] sm:$0xff]   ;;  %v2080_v9 = vld [vmem:[#allocation5 + $0x30] sm:$0xff]   ;;  %s1519_s24 = sshll.u32 %s2755_s11, 4  ;;  %s2250_s28 = scalar_lea.vmem %s2249_s6, 4096  ;;  %s2777_s24 = int_to_ptr.vmem [resolvable:$true] %s1519_s24 }
  0x88   : > { %1803 = vmatprep.subr.bf16.mxu0 %v2075_v1  ;;  %v2090_v7 = vld [vmem:[#allocation7] sm:$0xff]   ;;  %v2091_v8 = vld [vmem:[#allocation7 + $0x8] sm:$0xff]   ;;  %v2092_v10 = vld [vmem:[#allocation7 + $0x10] sm:$0xff]   ;;  %s2244_s13 = scalar_lea.vmem %s2777_s24, 2048  ;;  %p2251_p12 = scmp.lt.s32.totalorder %s2777_s24, %s2249_s6 }
  0x89   : > { %1833 = vmatprep.subr.bf16.mxu1 %v2090_v7  ;;  %v2081_v11 = vld [vmem:[#allocation5 + $0x38] sm:$0xff]   ;;  %v2094_v13 = vld [vmem:[#allocation7 + $0x20] sm:$0xff]   ;;  %v2083_v14 = vld [vmem:[%s2568_s12 + $0x8] sm:$0xff]   ;;  %p2245_p10 = scmp.ne.s32.totalorder %s2777_s24, %s2244_s13  ;;  %p2252_p1 = scmp.lt.s32.totalorder %s2250_s28, %s2244_s13 }
  0x8a   : > { %1834 = vmatpush3.bf16.msra.mxu1 %v2090_v7  ;;  %v2093_v12 = vld [vmem:[#allocation7 + $0x18] sm:$0xff]   ;;  %v2084_v15 = vld [vmem:[%s2568_s12 + $0x10] sm:$0xff]   ;;  %v2095_v16 = vld [vmem:[#allocation7 + $0x28] sm:$0xff]  }
  0x8b   : > { %1804 = vmatpush3.bf16.msra.mxu0 %v2075_v1  ;;  %1835 = vmatprep.subr.bf16.mxu1 %v2091_v8  ;;  %v2085_v17 = vld [vmem:[%s2568_s12 + $0x18] sm:$0xff]   ;;  %v2086_v18 = vld [vmem:[%s2568_s12 + $0x20] sm:$0xff]   ;;  %v2087_v19 = vld [vmem:[%s2568_s12 + $0x28] sm:$0xff]   ;;  %p2246_p3 = pnand %p2245_p10, %p2513_p5  ;;  %p2253_p2 = por %p2252_p1, %p2251_p12 }
  0x8c   : > { %1805 = vmatprep.subr.bf16.mxu0 %v2076_v2  ;;  %v2088_v20 = vld [vmem:[%s2568_s12 + $0x30] sm:$0xff]   ;;  %v2089_v21 = vld [vmem:[%s2568_s12 + $0x38] sm:$0xff]   ;;  %v2098_v24 = vld [vmem:[#allocation7 + $0x40] sm:$0xff]   ;;  %s1704_s12 = sshll.u32 %s2380_s22, 11  ;;  %s1506_s22 = scalar_lea.sflag [#allocation4], %s2564_s29 }
  0x8d   : > { %v2096_v22 = vld [vmem:[#allocation7 + $0x30] sm:$0xff]   ;;  %v2097_v23 = vld [vmem:[#allocation7 + $0x38] sm:$0xff]   ;;  %v2099_v25 = vld [vmem:[#allocation7 + $0x48] sm:$0xff]   ;;  %s2775_s27 = scalar_lea.hbm %s2829_s5, %s1704_s12  ;;  %p2247_p7 = pneg %p2246_p3 }
  0x8e   : > { %1836 = vmatpush3.bf16.msra.mxu1 %v2091_v8  ;;  %v2100_v26 = vld [vmem:[#allocation7 + $0x50] sm:$0xff]   ;;  %v2101_v27 = vld [vmem:[#allocation7 + $0x58] sm:$0xff]   ;;  %v2102_v28 = vld [vmem:[#allocation7 + $0x60] sm:$0xff]  }
  0x8f   : > { %1806 = vmatpush3.bf16.msra.mxu0 %v2076_v2  ;;  %1837 = vmatprep.subr.bf16.mxu1 %v2092_v10  ;;  %v2103_v29 = vld [vmem:[#allocation7 + $0x68] sm:$0xff]   ;;  %v1636_v30 = vld [vmem:[%s2828_s4] ss:$0 sm:$0xff]  ;;  %p2254_p4 = pnand %p2253_p2, %p2247_p7 }
  0x90   : > { %1807 = vmatprep.subr.bf16.mxu0 %v2077_v3 }
  0x92   : > { %1838 = vmatpush3.bf16.msra.mxu1 %v2092_v10 }
  0x93   : > { %1808 = vmatpush3.bf16.msra.mxu0 %v2077_v3  ;;  %1839 = vmatprep.subr.bf16.mxu1 %v2093_v12 }
  0x94   : > { %1809 = vmatprep.subr.bf16.mxu0 %v2078_v5 }
  0x96   : > { %1840 = vmatpush3.bf16.msra.mxu1 %v2093_v12 }
  0x97   : > { %1810 = vmatpush3.bf16.msra.mxu0 %v2078_v5  ;;  %1841 = vmatprep.subr.bf16.mxu1 %v2094_v13 }
  0x98   : > { %1811 = vmatprep.subr.bf16.mxu0 %v2079_v6 }
  0x9a   : > { %1842 = vmatpush3.bf16.msra.mxu1 %v2094_v13 }
  0x9b   : > { %1812 = vmatpush3.bf16.msra.mxu0 %v2079_v6  ;;  %1843 = vmatprep.subr.bf16.mxu1 %v2095_v16 }
  0x9c   : > { %1813 = vmatprep.subr.bf16.mxu0 %v2080_v9 }
  0x9e   : > { %1844 = vmatpush3.bf16.msra.mxu1 %v2095_v16 }
  0x9f   : > { %1814 = vmatpush3.bf16.msra.mxu0 %v2080_v9  ;;  %1845 = vmatprep.subr.bf16.mxu1 %v2096_v22 }
  0xa0   : > { %1815 = vmatprep.subr.bf16.mxu0 %v2081_v11 }
  0xa2   : > { %1846 = vmatpush3.bf16.msra.mxu1 %v2096_v22 }
  0xa3   : > { %1816 = vmatpush3.bf16.msra.mxu0 %v2081_v11  ;;  %1847 = vmatprep.subr.bf16.mxu1 %v2097_v23 }
  0xa4   : > { %1865 = vmatprep.subr.bf16.mxu0 %v2098_v24 }
  0xa6   : > { %1818 = vmatmul.mubr.bf16.vlgmr.msra.gmra.mrb[0].mxu0 %v2083_v14  ;;  %1848 = vmatpush3.bf16.msra.mxu1 %v2097_v23  ;;  %v2104_v23 = vld [vmem:[#allocation7 + $0x70] sm:$0xff]  }
  0xa7   : > { %1821 = vmatprep.mubr.bf16.mxu0 %v2084_v15  ;;  %1866 = vmatpush3.bf16.msra.mxu0 %v2098_v24  ;;  %v2105_v24 = vld [vmem:[#allocation7 + $0x78] sm:$0xff]  }
  0xa8   : > { %1867 = vmatprep.subr.bf16.mxu0 %v2099_v25 }
  0xab   : > { %1868 = vmatpush3.bf16.msra.mxu0 %v2099_v25  ;;  %v2106_v25 = vld [vmem:[#allocation7 + $0x80] sm:$0xff]  }
  0xac   : > { %1869 = vmatprep.subr.bf16.mxu0 %v2100_v26  ;;  %1897 = vmatprep.subr.bf16.mxu1 %v2106_v25 }
  0xae   : > { %1822 = vmatmul.mubr.bf16.gmra.mrb[4].mxu0 %v2085_v17 }
  0xaf   : > { %1825 = vmatprep.mubr.bf16.mxu0 %v2086_v18  ;;  %1870 = vmatpush3.bf16.msra.mxu0 %v2100_v26  ;;  %v2107_v26 = vld [vmem:[#allocation7 + $0x88] sm:$0xff]  }
  0xb0   : > { %1871 = vmatprep.subr.bf16.mxu0 %v2101_v27 }
  0xb3   : > { %1872 = vmatpush3.bf16.msra.mxu0 %v2101_v27  ;;  %v2108_v27 = vld [vmem:[#allocation7 + $0x90] sm:$0xff]  }
  0xb4   : > { %1873 = vmatprep.subr.bf16.mxu0 %v2102_v28 }
  0xb6   : > { %1826 = vmatmul.mubr.bf16.gmra.mrb[8].mxu0 %v2087_v19 }
  0xb7   : > { %1829 = vmatprep.mubr.bf16.mxu0 %v2088_v20  ;;  %1874 = vmatpush3.bf16.msra.mxu0 %v2102_v28  ;;  %v2109_v28 = vld [vmem:[#allocation7 + $0x98] sm:$0xff]  }
  0xb8   : > { %1875 = vmatprep.subr.bf16.mxu0 %v2103_v29 }
  0xbb   : > { %1876 = vmatpush3.bf16.msra.mxu0 %v2103_v29  ;;  %v2110_v29 = vld [vmem:[#allocation7 + $0xa0] sm:$0xff]  }
  0xbc   : > { %1877 = vmatprep.subr.bf16.mxu0 %v2104_v23 }
  0xbe   : > { %1830 = vmatmul.mubr.bf16.gmra.mrb[12].mxu0 %v2089_v21 }
  0xbf   : > { %1878 = vmatpush3.bf16.msra.mxu0 %v2104_v23 }
  0xc0   : > { %1879 = vmatprep.subr.bf16.mxu0 %v2105_v24 }
  0xc3   : > { %1880 = vmatpush3.bf16.msra.mxu0 %v2105_v24 }
 0x179   : > { %v1819_v31 = vpop.f32.mrb[0].mxu0 }
 0x17a   : > { %v457_v32 = vpop.f32.mrb[1].mxu0  ;;  %v2595_v35 = vadd.f32 %v1819_v31, %v1636_v30 }
 0x17b   : > { %v2593_v33 = vadd.f32 %v1636_v30, %v457_v32  ;;  %v1820_v34 = vpop.f32.mrb[2].mxu0 }
 0x17c   : > { %v2597_v36 = vadd.f32 %v1820_v34, %v1636_v30  ;;  %v460_v37 = vpop.f32.mrb[3].mxu0  ;;  %v522_v42 = vmax.f32 %v2595_v35, 0.0 }
 0x17d   : > { %v2599_v38 = vadd.f32 %v1636_v30, %v460_v37  ;;  %v520_v40 = vmax.f32 %v2593_v33, 0.0 }
 0x17e   : > { %v523_v39 = vmax.f32 %v2597_v36, 0.0 }
 0x17f   : > { %v521_v41 = vmax.f32 %v2599_v38, 0.0 }
 0x180   : > { %v537_v46 = vpack.c.bf16 %v523_v39, %v522_v42 }
 0x181   : > { %v1823_v43 = vpop.f32.mrb[4].mxu0  ;;  %v536_v44 = vpack.c.bf16 %v521_v41, %v520_v40 }
 0x182   : > { %v473_v45 = vpop.f32.mrb[5].mxu0  ;;  %v2607_v49 = vadd.f32 %v1823_v43, %v1636_v30 }
 0x183   : > { %v2605_v47 = vadd.f32 %v1636_v30, %v473_v45  ;;  %v1824_v48 = vpop.f32.mrb[6].mxu0  ;;  %1849 = vmatprep.mubr.bf16.mxu1 %v536_v44 }
 0x184   : > { %v2609_v50 = vadd.f32 %v1824_v48, %v1636_v30  ;;  %v476_v51 = vpop.f32.mrb[7].mxu0  ;;  %1850 = vmatmul.mubr.bf16.vlgmr.msra.gmra.mrb[0].mxu1 %v537_v46  ;;  %v526_v56 = vmax.f32 %v2607_v49, 0.0 }
 0x185   : > { %v2611_v52 = vadd.f32 %v1636_v30, %v476_v51  ;;  %v524_v54 = vmax.f32 %v2605_v47, 0.0  ;;  %1898 = vmatpush3.bf16.msra.mxu1 %v2106_v25 }
 0x186   : > { %v527_v53 = vmax.f32 %v2609_v50, 0.0  ;;  %1899 = vmatprep.subr.bf16.mxu1 %v2107_v26 }
 0x187   : > { %v525_v55 = vmax.f32 %v2611_v52, 0.0 }
 0x188   : > { %v539_v60 = vpack.c.bf16 %v527_v53, %v526_v56 }
 0x189   : > { %v1827_v57 = vpop.f32.mrb[8].mxu0  ;;  %v538_v58 = vpack.c.bf16 %v525_v55, %v524_v54  ;;  %1900 = vmatpush3.bf16.msra.mxu1 %v2107_v26 }
 0x18a   : > { %v489_v59 = vpop.f32.mrb[9].mxu0  ;;  %v2619_v63 = vadd.f32 %v1827_v57, %v1636_v30  ;;  %1901 = vmatprep.subr.bf16.mxu1 %v2108_v27 }
 0x18b   : > { %v2617_v61 = vadd.f32 %v1636_v30, %v489_v59  ;;  %v1828_v62 = vpop.f32.mrb[10].mxu0  ;;  %1853 = vmatprep.mubr.bf16.mxu1 %v538_v58 }
 0x18c   : > { %v2621_v0 = vadd.f32 %v1828_v62, %v1636_v30  ;;  %v492_v1 = vpop.f32.mrb[11].mxu0  ;;  %1854 = vmatmul.mubr.bf16.gmra.mrb[4].mxu1 %v539_v60  ;;  %v530_v6 = vmax.f32 %v2619_v63, 0.0 }
 0x18d   : > { %v2623_v2 = vadd.f32 %v1636_v30, %v492_v1  ;;  %v528_v4 = vmax.f32 %v2617_v61, 0.0  ;;  %1902 = vmatpush3.bf16.msra.mxu1 %v2108_v27 }
 0x18e   : > { %v531_v3 = vmax.f32 %v2621_v0, 0.0  ;;  %1903 = vmatprep.subr.bf16.mxu1 %v2109_v28 }
 0x18f   : > { %v529_v5 = vmax.f32 %v2623_v2, 0.0 }
 0x190   : > { %v541_v10 = vpack.c.bf16 %v531_v3, %v530_v6 }
 0x191   : > { %v1831_v7 = vpop.f32.mrb[12].mxu0  ;;  %v540_v8 = vpack.c.bf16 %v529_v5, %v528_v4  ;;  %1904 = vmatpush3.bf16.msra.mxu1 %v2109_v28 }
 0x192   : > { %v505_v9 = vpop.f32.mrb[13].mxu0  ;;  %v2631_v13 = vadd.f32 %v1831_v7, %v1636_v30  ;;  %1905 = vmatprep.subr.bf16.mxu1 %v2110_v29 }
 0x193   : > { %v2629_v11 = vadd.f32 %v1636_v30, %v505_v9  ;;  %v1832_v12 = vpop.f32.mrb[14].mxu0  ;;  %1857 = vmatprep.mubr.bf16.mxu1 %v540_v8 }
 0x194   : > { %v2633_v14 = vadd.f32 %v1832_v12, %v1636_v30  ;;  %v508_v15 = vpop.f32.mrb[15].mxu0  ;;  %1858 = vmatmul.mubr.bf16.gmra.mrb[8].mxu1 %v541_v10  ;;  %v534_v20 = vmax.f32 %v2631_v13, 0.0 }
 0x195   : > { %v2635_v16 = vadd.f32 %v1636_v30, %v508_v15  ;;  %v532_v18 = vmax.f32 %v2629_v11, 0.0  ;;  %1906 = vmatpush3.bf16.msra.mxu1 %v2110_v29  ;;  %v1653_v30 = vld [vmem:[%s2828_s4 + $0x1] ss:$0 sm:$0xff] }
 0x196   : > { %v535_v17 = vmax.f32 %v2633_v14, 0.0 }
 0x197   : > { %v533_v19 = vmax.f32 %v2635_v16, 0.0 }
 0x198   : > { %v543_v22 = vpack.c.bf16 %v535_v17, %v534_v20 }
 0x199   : > { %v542_v21 = vpack.c.bf16 %v533_v19, %v532_v18 }
 0x19b   : > { %1861 = vmatprep.mubr.bf16.mxu1 %v542_v21 }
 0x19c   : > { %1862 = vmatmul.mubr.bf16.gmra.mrb[12].mxu1 %v543_v22 }
 0x257   : > { %v1851_v31 = vpop.f32.mrb[0].mxu1 }
 0x258   : > { %v656_v32 = vadd.f32 %v1851_v31, %v1653_v30  ;;  %v647_v34 = vpop.f32.mrb[1].mxu1 }
 0x259   : > { %v648_v37 = vadd.f32 %v1653_v30, %v647_v34  ;;  %v1852_v39 = vpop.f32.mrb[2].mxu1 }
 0x25a   : > { %v659_v40 = vadd.f32 %v1852_v39, %v1653_v30  ;;  %v650_v41 = vpop.f32.mrb[3].mxu1  ;;  %v712_v43 = vmax.f32 %v656_v32, 0.0 }
 0x25b   : > { %v651_v42 = vadd.f32 %v1653_v30, %v650_v41  ;;  %v710_v45 = vmax.f32 %v648_v37, 0.0 }
 0x25c   : > { %v713_v44 = vmax.f32 %v659_v40, 0.0 }
 0x25d   : > { %v711_v46 = vmax.f32 %v651_v42, 0.0 }
 0x25e   : > { %v727_v48 = vpack.c.bf16 %v713_v44, %v712_v43  ;;  %v2111_v44 = vld [vmem:[#allocation7 + $0xa8] sm:$0xff]  }
 0x25f   : > { %v726_v51 = vpack.c.bf16 %v711_v46, %v710_v45  ;;  %v1855_v53 = vpop.f32.mrb[4].mxu1  ;;  %1907 = vmatprep.subr.bf16.mxu1 %v2111_v44  ;;  %v2112_v45 = vld [vmem:[#allocation7 + $0xb0] sm:$0xff]   ;;  %v2113_v46 = vld [vmem:[#allocation7 + $0xb8] sm:$0xff]  }
 0x260   : > { %v672_v54 = vadd.f32 %v1855_v53, %v1653_v30  ;;  %v663_v55 = vpop.f32.mrb[5].mxu1  ;;  %1908 = vmatpush3.bf16.msra.mxu1 %v2111_v44  ;;  %v2117_v53 = vld [vmem:[#allocation7 + $0xd8] sm:$0xff]  }
 0x261   : > { %v664_v56 = vadd.f32 %v1653_v30, %v663_v55  ;;  %v1856_v57 = vpop.f32.mrb[6].mxu1  ;;  %1881 = vmatprep.mubr.bf16.mxu0 %v726_v51  ;;  %1909 = vmatprep.subr.bf16.mxu1 %v2112_v45  ;;  %v2115_v51 = vld [vmem:[#allocation7 + $0xc8] sm:$0xff]  }
 0x262   : > { %v675_v58 = vadd.f32 %v1856_v57, %v1653_v30  ;;  %v666_v59 = vpop.f32.mrb[7].mxu1  ;;  %1882 = vmatmul.mubr.bf16.vlgmr.msra.gmra.mrb[16].mxu0 %v727_v48  ;;  %v716_v62 = vmax.f32 %v672_v54, 0.0  ;;  %v2114_v48 = vld [vmem:[#allocation7 + $0xc0] sm:$0xff]   ;;  %v2119_v55 = vld [vmem:[#allocation7 + $0xe8] sm:$0xff]  }
 0x263   : > { %v667_v60 = vadd.f32 %v1653_v30, %v666_v59  ;;  %v714_v3 = vmax.f32 %v664_v56, 0.0  ;;  %1929 = vmatprep.subr.bf16.mxu0 %v2114_v48  ;;  %v2118_v54 = vld [vmem:[#allocation7 + $0xe0] sm:$0xff]  }
 0x264   : > { %v717_v1 = vmax.f32 %v675_v58, 0.0  ;;  %1910 = vmatpush3.bf16.msra.mxu1 %v2112_v45  ;;  %1930 = vmatpush3.bf16.msra.mxu0 %v2114_v48  ;;  %v2647_v56 = vld [vmem:[%s2828_s4 + $0x2] ss:$0 sm:$0xff] }
 0x265   : > { %v715_v4 = vmax.f32 %v667_v60, 0.0  ;;  %1911 = vmatprep.subr.bf16.mxu1 %v2113_v46  ;;  %1931 = vmatprep.subr.bf16.mxu0 %v2115_v51 }
 0x266   : > { %v729_v5 = vpack.c.bf16 %v717_v1, %v716_v62 }
 0x267   : > { %v728_v6 = vpack.c.bf16 %v715_v4, %v714_v3  ;;  %v1859_v7 = vpop.f32.mrb[8].mxu1 }
 0x268   : > { %v688_v8 = vadd.f32 %v1859_v7, %v1653_v30  ;;  %v679_v9 = vpop.f32.mrb[9].mxu1  ;;  %1912 = vmatpush3.bf16.msra.mxu1 %v2113_v46  ;;  %1932 = vmatpush3.bf16.msra.mxu0 %v2115_v51 }
 0x269   : > { %v680_v10 = vadd.f32 %v1653_v30, %v679_v9  ;;  %v1860_v12 = vpop.f32.mrb[10].mxu1  ;;  %1885 = vmatprep.mubr.bf16.mxu0 %v728_v6 }
 0x26a   : > { %v691_v15 = vadd.f32 %v1860_v12, %v1653_v30  ;;  %v682_v17 = vpop.f32.mrb[11].mxu1  ;;  %1886 = vmatmul.mubr.bf16.gmra.mrb[20].mxu0 %v729_v5  ;;  %v720_v19 = vmax.f32 %v688_v8, 0.0 }
 0x26b   : > { %v683_v18 = vadd.f32 %v1653_v30, %v682_v17  ;;  %v718_v21 = vmax.f32 %v680_v10, 0.0 }
 0x26c   : > { %v721_v20 = vmax.f32 %v691_v15, 0.0 }
 0x26d   : > { %v719_v22 = vmax.f32 %v683_v18, 0.0 }
 0x26e   : > { %v731_v23 = vpack.c.bf16 %v721_v20, %v720_v19 }
 0x26f   : > { %v730_v24 = vpack.c.bf16 %v719_v22, %v718_v21  ;;  %v1863_v25 = vpop.f32.mrb[12].mxu1 }
 0x270   : > { %v704_v26 = vadd.f32 %v1863_v25, %v1653_v30  ;;  %v695_v27 = vpop.f32.mrb[13].mxu1 }
 0x271   : > { %v696_v28 = vadd.f32 %v1653_v30, %v695_v27  ;;  %v1864_v29 = vpop.f32.mrb[14].mxu1  ;;  %1889 = vmatprep.mubr.bf16.mxu0 %v730_v24 }
 0x272   : > { %v707_v31 = vadd.f32 %v1864_v29, %v1653_v30  ;;  %v698_v32 = vpop.f32.mrb[15].mxu1  ;;  %1890 = vmatmul.mubr.bf16.gmra.mrb[24].mxu0 %v731_v23  ;;  %v724_v37 = vmax.f32 %v704_v26, 0.0 }
 0x273   : > { %v699_v34 = vadd.f32 %v1653_v30, %v698_v32  ;;  %v722_v40 = vmax.f32 %v696_v28, 0.0  ;;  %v2116_v30 = vld [vmem:[#allocation7 + $0xd0] sm:$0xff]  }
 0x274   : > { %v725_v39 = vmax.f32 %v707_v31, 0.0  ;;  %1933 = vmatprep.subr.bf16.mxu0 %v2116_v30 }
 0x275   : > { %v723_v41 = vmax.f32 %v699_v34, 0.0  ;;  %1934 = vmatpush3.bf16.msra.mxu0 %v2116_v30 }
 0x276   : > { %v733_v42 = vpack.c.bf16 %v725_v39, %v724_v37  ;;  %1935 = vmatprep.subr.bf16.mxu0 %v2117_v53 }
 0x277   : > { %v732_v43 = vpack.c.bf16 %v723_v41, %v722_v40 }
 0x279   : > { %1893 = vmatprep.mubr.bf16.mxu0 %v732_v43  ;;  %1936 = vmatpush3.bf16.msra.mxu0 %v2117_v53 }
 0x27a   : > { %1894 = vmatmul.mubr.bf16.gmra.mrb[28].mxu0 %v733_v42  ;;  %1937 = vmatprep.subr.bf16.mxu0 %v2118_v54 }
 0x27d   : > { %1938 = vmatpush3.bf16.msra.mxu0 %v2118_v54 }
 0x27e   : > { %1939 = vmatprep.subr.bf16.mxu0 %v2119_v55 }
 0x281   : > { %1940 = vmatpush3.bf16.msra.mxu0 %v2119_v55 }
 0x335   : > { %v1883_v57 = vpop.f32.mrb[16].mxu0 }
 0x336   : > { %v847_v58 = vadd.f32 %v1883_v57, %v2647_v56  ;;  %v838_v59 = vpop.f32.mrb[17].mxu0 }
 0x337   : > { %v839_v60 = vadd.f32 %v2647_v56, %v838_v59  ;;  %v1884_v62 = vpop.f32.mrb[18].mxu0 }
 0x338   : > { %v850_v1 = vadd.f32 %v1884_v62, %v2647_v56  ;;  %v841_v3 = vpop.f32.mrb[19].mxu0  ;;  %v2657_v6 = vadd.f32 %v847_v58, %v2595_v35 }
 0x339   : > { %v2653_v4 = vadd.f32 %v839_v60, %v2593_v33  ;;  %v842_v5 = vadd.f32 %v2647_v56, %v841_v3 }
 0x33a   : > { %v2660_v7 = vadd.f32 %v850_v1, %v2597_v36  ;;  %v919_v33 = vmax.f32 %v2657_v6, 0.0 }
 0x33b   : > { %v2663_v8 = vadd.f32 %v842_v5, %v2599_v38  ;;  %v917_v10 = vmax.f32 %v2653_v4, 0.0 }
 0x33c   : > { %v920_v9 = vmax.f32 %v2660_v7, 0.0 }
 0x33d   : > { %v918_v12 = vmax.f32 %v2663_v8, 0.0  ;;  %v1887_v15 = vpop.f32.mrb[20].mxu0 }
 0x33e   : > { %v863_v17 = vadd.f32 %v1887_v15, %v2647_v56  ;;  %v854_v18 = vpop.f32.mrb[21].mxu0  ;;  %v934_v20 = vpack.c.bf16 %v920_v9, %v919_v33  ;;  %v2123_v15 = vld [vmem:[#allocation8 + $0x8] sm:$0xff]   ;;  %v2124_v33 = vld [vmem:[#allocation8 + $0x10] sm:$0xff]  }
 0x33f   : > { %v855_v35 = vadd.f32 %v2647_v56, %v854_v18  ;;  %v1888_v19 = vpop.f32.mrb[22].mxu0  ;;  %v933_v36 = vpack.c.bf16 %v918_v12, %v917_v10  ;;  %v2126_v18 = vld [vmem:[#allocation8 + $0x20] sm:$0xff]  }
 0x340   : > { %v866_v38 = vadd.f32 %v1888_v19, %v2647_v56  ;;  %v857_v21 = vpop.f32.mrb[23].mxu0  ;;  %v2677_v24 = vadd.f32 %v863_v17, %v2607_v49  ;;  %v2125_v17 = vld [vmem:[#allocation8 + $0x18] sm:$0xff]   ;;  %v1671_v19 = vld [vmem:[%s2828_s4 + $0x3] ss:$0 sm:$0xff] }
 0x341   : > { %v2673_v22 = vadd.f32 %v855_v35, %v2605_v47  ;;  %v858_v23 = vadd.f32 %v2647_v56, %v857_v21  ;;  %1913 = vmatprep.mubr.bf16.mxu1 %v933_v36  ;;  %v2127_v35 = vld [vmem:[#allocation8 + $0x28] sm:$0xff]  }
 0x342   : > { %v2680_v25 = vadd.f32 %v866_v38, %v2609_v50  ;;  %1914 = vmatmul.mubr.bf16.vlgmr.msra.gmra.mrb[16].mxu1 %v934_v20  ;;  %v923_v31 = vmax.f32 %v2677_v24, 0.0 }
 0x343   : > { %v2683_v26 = vadd.f32 %v858_v23, %v2611_v52  ;;  %v921_v28 = vmax.f32 %v2673_v22, 0.0 }
 0x344   : > { %v924_v27 = vmax.f32 %v2680_v25, 0.0 }
 0x345   : > { %v922_v47 = vmax.f32 %v2683_v26, 0.0  ;;  %v1891_v29 = vpop.f32.mrb[24].mxu0 }
 0x346   : > { %v879_v32 = vadd.f32 %v1891_v29, %v2647_v56  ;;  %v870_v49 = vpop.f32.mrb[25].mxu0  ;;  %v936_v40 = vpack.c.bf16 %v924_v27, %v923_v31 }
 0x347   : > { %v871_v34 = vadd.f32 %v2647_v56, %v870_v49  ;;  %v1892_v50 = vpop.f32.mrb[26].mxu0  ;;  %v935_v37 = vpack.c.bf16 %v922_v47, %v921_v28 }
 0x348   : > { %v882_v39 = vadd.f32 %v1892_v50, %v2647_v56  ;;  %v873_v52 = vpop.f32.mrb[27].mxu0  ;;  %v2697_v43 = vadd.f32 %v879_v32, %v2619_v63 }
 0x349   : > { %v2693_v41 = vadd.f32 %v871_v34, %v2617_v61  ;;  %v874_v42 = vadd.f32 %v2647_v56, %v873_v52  ;;  %1917 = vmatprep.mubr.bf16.mxu1 %v935_v37 }
 0x34a   : > { %v2700_v44 = vadd.f32 %v882_v39, %v2621_v0  ;;  %1918 = vmatmul.mubr.bf16.gmra.mrb[20].mxu1 %v936_v40  ;;  %v927_v30 = vmax.f32 %v2697_v43, 0.0 }
 0x34b   : > { %v2703_v45 = vadd.f32 %v874_v42, %v2623_v2  ;;  %v925_v48 = vmax.f32 %v2693_v41, 0.0 }
 0x34c   : > { %v928_v46 = vmax.f32 %v2700_v44, 0.0 }
 0x34d   : > { %v926_v61 = vmax.f32 %v2703_v45, 0.0  ;;  %v1895_v51 = vpop.f32.mrb[28].mxu0 }
 0x34e   : > { %v895_v53 = vadd.f32 %v1895_v51, %v2647_v56  ;;  %v886_v63 = vpop.f32.mrb[29].mxu0  ;;  %v938_v58 = vpack.c.bf16 %v928_v46, %v927_v30 }
 0x34f   : > { %v887_v54 = vadd.f32 %v2647_v56, %v886_v63  ;;  %v1896_v0 = vpop.f32.mrb[30].mxu0  ;;  %v937_v55 = vpack.c.bf16 %v926_v61, %v925_v48 }
 0x350   : > { %v898_v57 = vadd.f32 %v1896_v0, %v2647_v56  ;;  %v889_v2 = vpop.f32.mrb[31].mxu0  ;;  %v2717_v62 = vadd.f32 %v895_v53, %v2631_v13  ;;  %v2120_v13 = vld [vmem:[#allocation7 + $0xf0] sm:$0xff]  }
 0x351   : > { %v2713_v59 = vadd.f32 %v887_v54, %v2629_v11  ;;  %v890_v60 = vadd.f32 %v2647_v56, %v889_v2  ;;  %1921 = vmatprep.mubr.bf16.mxu1 %v937_v55  ;;  %1941 = vmatprep.subr.bf16.mxu0 %v2120_v13 }
 0x352   : > { %v2720_v1 = vadd.f32 %v898_v57, %v2633_v14  ;;  %1922 = vmatmul.mubr.bf16.gmra.mrb[24].mxu1 %v938_v58  ;;  %v931_v10 = vmax.f32 %v2717_v62, 0.0  ;;  %1942 = vmatpush3.bf16.msra.mxu0 %v2120_v13  ;;  %v2121_v14 = vld [vmem:[#allocation7 + $0xf8] sm:$0xff]  }
 0x353   : > { %v2723_v3 = vadd.f32 %v890_v60, %v2635_v16  ;;  %v929_v9 = vmax.f32 %v2713_v59, 0.0  ;;  %1943 = vmatprep.subr.bf16.mxu0 %v2121_v14  ;;  %v2122_v16 = vld [vmem:[#allocation8] sm:$0xff]  }
 0x354   : > { %v932_v5 = vmax.f32 %v2720_v1, 0.0  ;;  %1961 = vmatprep.subr.bf16.mxu1 %v2122_v16 }
 0x355   : > { %v930_v11 = vmax.f32 %v2723_v3, 0.0  ;;  %1962 = vmatpush3.bf16.msra.mxu1 %v2122_v16 }
 0x356   : > { %v940_v12 = vpack.c.bf16 %v932_v5, %v931_v10  ;;  %1944 = vmatpush3.bf16.msra.mxu0 %v2121_v14  ;;  %1963 = vmatprep.subr.bf16.mxu1 %v2123_v15 }
 0x357   : > { %v939_v56 = vpack.c.bf16 %v930_v11, %v929_v9 }
 0x359   : > { %1925 = vmatprep.mubr.bf16.mxu1 %v939_v56  ;;  %1964 = vmatpush3.bf16.msra.mxu1 %v2123_v15 }
 0x35a   : > { %1926 = vmatmul.mubr.bf16.gmra.mrb[28].mxu1 %v940_v12  ;;  %1965 = vmatprep.subr.bf16.mxu1 %v2124_v33 }
 0x35d   : > { %1966 = vmatpush3.bf16.msra.mxu1 %v2124_v33 }
 0x35e   : > { %1967 = vmatprep.subr.bf16.mxu1 %v2125_v17 }
 0x361   : > { %1968 = vmatpush3.bf16.msra.mxu1 %v2125_v17 }
 0x362   : > { %1969 = vmatprep.subr.bf16.mxu1 %v2126_v18 }
 0x365   : > { %1970 = vmatpush3.bf16.msra.mxu1 %v2126_v18 }
 0x366   : > { %1971 = vmatprep.subr.bf16.mxu1 %v2127_v35 }
 0x369   : > { %1972 = vmatpush3.bf16.msra.mxu1 %v2127_v35 }
 0x415   : > { %v1915_v36 = vpop.f32.mrb[16].mxu1 }
 0x416   : > { %v1054_v20 = vadd.f32 %v1915_v36, %v1671_v19  ;;  %v1045_v38 = vpop.f32.mrb[17].mxu1 }
 0x417   : > { %v1046_v21 = vadd.f32 %v1671_v19, %v1045_v38  ;;  %v1916_v23 = vpop.f32.mrb[18].mxu1 }
 0x418   : > { %v1057_v27 = vadd.f32 %v1916_v23, %v1671_v19  ;;  %v1048_v28 = vpop.f32.mrb[19].mxu1  ;;  %v1110_v29 = vmax.f32 %v1054_v20, 0.0 }
 0x419   : > { %v1049_v47 = vadd.f32 %v1671_v19, %v1048_v28  ;;  %v1108_v32 = vmax.f32 %v1046_v21, 0.0 }
 0x41a   : > { %v1111_v31 = vmax.f32 %v1057_v27, 0.0 }
 0x41b   : > { %v1109_v49 = vmax.f32 %v1049_v47, 0.0 }
 0x41c   : > { %v1125_v34 = vpack.c.bf16 %v1111_v31, %v1110_v29  ;;  %v2128_v31 = vld [vmem:[#allocation8 + $0x30] sm:$0xff]  }
 0x41d   : > { %v1124_v50 = vpack.c.bf16 %v1109_v49, %v1108_v32  ;;  %v1919_v37 = vpop.f32.mrb[20].mxu1  ;;  %1973 = vmatprep.subr.bf16.mxu1 %v2128_v31  ;;  %v2129_v32 = vld [vmem:[#allocation8 + $0x38] sm:$0xff]   ;;  %v1680_v49 = vld [vmem:[%s2828_s4 + $0x4] ss:$0 sm:$0xff] }
 0x41e   : > { %v1070_v39 = vadd.f32 %v1919_v37, %v1671_v19  ;;  %v1061_v52 = vpop.f32.mrb[21].mxu1  ;;  %1974 = vmatpush3.bf16.msra.mxu1 %v2128_v31 }
 0x41f   : > { %v1062_v40 = vadd.f32 %v1671_v19, %v1061_v52  ;;  %v1920_v42 = vpop.f32.mrb[22].mxu1  ;;  %1945 = vmatprep.mubr.bf16.mxu0 %v1124_v50  ;;  %1975 = vmatprep.subr.bf16.mxu1 %v2129_v32 }
 0x420   : > { %v1073_v46 = vadd.f32 %v1920_v42, %v1671_v19  ;;  %v1064_v48 = vpop.f32.mrb[23].mxu1  ;;  %1946 = vmatmul.mubr.bf16.vlgmr.msra.gmra.mrb[32].mxu0 %v1125_v34  ;;  %v1114_v51 = vmax.f32 %v1070_v39, 0.0 }
 0x421   : > { %v1065_v61 = vadd.f32 %v1671_v19, %v1064_v48  ;;  %v1112_v53 = vmax.f32 %v1062_v40, 0.0 }
 0x422   : > { %v1115_v30 = vmax.f32 %v1073_v46, 0.0  ;;  %1976 = vmatpush3.bf16.msra.mxu1 %v2129_v32 }
 0x423   : > { %v1113_v63 = vmax.f32 %v1065_v61, 0.0 }
 0x424   : > { %v1127_v54 = vpack.c.bf16 %v1115_v30, %v1114_v51 }
 0x425   : > { %v1126_v0 = vpack.c.bf16 %v1113_v63, %v1112_v53  ;;  %v1923_v55 = vpop.f32.mrb[24].mxu1 }
 0x426   : > { %v1086_v57 = vadd.f32 %v1923_v55, %v1671_v19  ;;  %v1077_v2 = vpop.f32.mrb[25].mxu1 }
 0x427   : > { %v1078_v58 = vadd.f32 %v1671_v19, %v1077_v2  ;;  %v1924_v60 = vpop.f32.mrb[26].mxu1  ;;  %1949 = vmatprep.mubr.bf16.mxu0 %v1126_v0 }
 0x428   : > { %v1089_v5 = vadd.f32 %v1924_v60, %v1671_v19  ;;  %v1080_v9 = vpop.f32.mrb[27].mxu1  ;;  %1950 = vmatmul.mubr.bf16.gmra.mrb[36].mxu0 %v1127_v54  ;;  %v1118_v10 = vmax.f32 %v1086_v57, 0.0 }
 0x429   : > { %v1081_v11 = vadd.f32 %v1671_v19, %v1080_v9  ;;  %v1116_v12 = vmax.f32 %v1078_v58, 0.0 }
 0x42a   : > { %v1119_v56 = vmax.f32 %v1089_v5, 0.0 }
 0x42b   : > { %v1117_v13 = vmax.f32 %v1081_v11, 0.0 }
 0x42c   : > { %v1129_v14 = vpack.c.bf16 %v1119_v56, %v1118_v10 }
 0x42d   : > { %v1128_v16 = vpack.c.bf16 %v1117_v13, %v1116_v12  ;;  %v1927_v15 = vpop.f32.mrb[28].mxu1 }
 0x42e   : > { %v1102_v33 = vadd.f32 %v1927_v15, %v1671_v19  ;;  %v1093_v17 = vpop.f32.mrb[29].mxu1 }
 0x42f   : > { %v1094_v18 = vadd.f32 %v1671_v19, %v1093_v17  ;;  %v1928_v35 = vpop.f32.mrb[30].mxu1  ;;  %1953 = vmatprep.mubr.bf16.mxu0 %v1128_v16 }
 0x430   : > { %v1105_v36 = vadd.f32 %v1928_v35, %v1671_v19  ;;  %v1096_v20 = vpop.f32.mrb[31].mxu1  ;;  %1954 = vmatmul.mubr.bf16.gmra.mrb[40].mxu0 %v1129_v14  ;;  %v1122_v21 = vmax.f32 %v1102_v33, 0.0 }
 0x431   : > { %v1097_v38 = vadd.f32 %v1671_v19, %v1096_v20  ;;  %v1120_v27 = vmax.f32 %v1094_v18, 0.0 }
 0x432   : > { %v1123_v23 = vmax.f32 %v1105_v36, 0.0 }
 0x433   : > { %v1121_v28 = vmax.f32 %v1097_v38, 0.0 }
 0x434   : > { %v1131_v47 = vpack.c.bf16 %v1123_v23, %v1122_v21 }
 0x435   : > { %v1130_v29 = vpack.c.bf16 %v1121_v28, %v1120_v27 }
 0x437   : > { %1957 = vmatprep.mubr.bf16.mxu0 %v1130_v29  ;;  %v1689_v29 = vld [vmem:[%s2828_s4 + $0x5] ss:$0 sm:$0xff] }
 0x438   : > { %1958 = vmatmul.mubr.bf16.gmra.mrb[44].mxu0 %v1131_v47 }
 0x4f3   : > { %v1947_v34 = vpop.f32.mrb[32].mxu0 }
 0x4f4   : > { %v1245_v19 = vadd.f32 %v1947_v34, %v1680_v49  ;;  %v1236_v50 = vpop.f32.mrb[33].mxu0 }
 0x4f5   : > { %v1237_v37 = vadd.f32 %v1680_v49, %v1236_v50  ;;  %v1948_v39 = vpop.f32.mrb[34].mxu0 }
 0x4f6   : > { %v1248_v52 = vadd.f32 %v1948_v39, %v1680_v49  ;;  %v1239_v40 = vpop.f32.mrb[35].mxu0  ;;  %v1301_v46 = vadd.f32 %v1245_v19, %v2657_v6 }
 0x4f7   : > { %v1240_v42 = vadd.f32 %v1680_v49, %v1239_v40  ;;  %v1299_v61 = vadd.f32 %v1237_v37, %v2653_v4 }
 0x4f8   : > { %v1302_v48 = vadd.f32 %v1248_v52, %v2660_v7 }
 0x4f9   : > { %v1300_v51 = vadd.f32 %v1240_v42, %v2663_v8 }
 0x4fa   : > { %v1316_v30 = vpack.c.bf16 %v1302_v48, %v1301_v46 }
 0x4fb   : > { %v1951_v53 = vpop.f32.mrb[36].mxu0  ;;  %v1315_v63 = vpack.c.bf16 %v1300_v51, %v1299_v61 }
 0x4fc   : > { %v1261_v54 = vadd.f32 %v1951_v53, %v1680_v49  ;;  %v1252_v0 = vpop.f32.mrb[37].mxu0 }
 0x4fd   : > { %v1253_v55 = vadd.f32 %v1680_v49, %v1252_v0  ;;  %v1952_v57 = vpop.f32.mrb[38].mxu0  ;;  %1977 = vmatprep.mubr.bf16.mxu1 %v1315_v63 }
 0x4fe   : > { %v1264_v2 = vadd.f32 %v1952_v57, %v1680_v49  ;;  %v1255_v58 = vpop.f32.mrb[39].mxu0  ;;  %1978 = vmatmul.mubr.bf16.vlgmr.msra.gmra.mrb[32].mxu1 %v1316_v30  ;;  %v1305_v6 = vadd.f32 %v1261_v54, %v2677_v24 }
 0x4ff   : > { %v1256_v60 = vadd.f32 %v1680_v49, %v1255_v58  ;;  %v1303_v4 = vadd.f32 %v1253_v55, %v2673_v22 }
 0x500   : > { %v1306_v7 = vadd.f32 %v1264_v2, %v2680_v25 }
 0x501   : > { %v1304_v8 = vadd.f32 %v1256_v60, %v2683_v26 }
 0x502   : > { %v1318_v5 = vpack.c.bf16 %v1306_v7, %v1305_v6 }
 0x503   : > { %v1955_v9 = vpop.f32.mrb[40].mxu0  ;;  %v1317_v11 = vpack.c.bf16 %v1304_v8, %v1303_v4 }
 0x504   : > { %v1277_v10 = vadd.f32 %v1955_v9, %v1680_v49  ;;  %v1268_v56 = vpop.f32.mrb[41].mxu0 }
 0x505   : > { %v1269_v12 = vadd.f32 %v1680_v49, %v1268_v56  ;;  %v1956_v13 = vpop.f32.mrb[42].mxu0  ;;  %1981 = vmatprep.mubr.bf16.mxu1 %v1317_v11 }
 0x506   : > { %v1280_v14 = vadd.f32 %v1956_v13, %v1680_v49  ;;  %v1271_v16 = vpop.f32.mrb[43].mxu0  ;;  %1982 = vmatmul.mubr.bf16.gmra.mrb[36].mxu1 %v1318_v5  ;;  %v1309_v24 = vadd.f32 %v1277_v10, %v2697_v43 }
 0x507   : > { %v1272_v15 = vadd.f32 %v1680_v49, %v1271_v16  ;;  %v1307_v22 = vadd.f32 %v1269_v12, %v2693_v41 }
 0x508   : > { %v1310_v25 = vadd.f32 %v1280_v14, %v2700_v44 }
 0x509   : > { %v1308_v26 = vadd.f32 %v1272_v15, %v2703_v45 }
 0x50a   : > { %v1320_v33 = vpack.c.bf16 %v1310_v25, %v1309_v24 }
 0x50b   : > { %v1959_v17 = vpop.f32.mrb[44].mxu0  ;;  %v1319_v18 = vpack.c.bf16 %v1308_v26, %v1307_v22 }
 0x50c   : > { %v1293_v35 = vadd.f32 %v1959_v17, %v1680_v49  ;;  %v1284_v36 = vpop.f32.mrb[45].mxu0 }
 0x50d   : > { %v1285_v20 = vadd.f32 %v1680_v49, %v1284_v36  ;;  %v1960_v38 = vpop.f32.mrb[46].mxu0  ;;  %1985 = vmatprep.mubr.bf16.mxu1 %v1319_v18 }
 0x50e   : > { %v1296_v21 = vadd.f32 %v1960_v38, %v1680_v49  ;;  %v1287_v23 = vpop.f32.mrb[47].mxu0  ;;  %1986 = vmatmul.mubr.bf16.gmra.mrb[40].mxu1 %v1320_v33  ;;  %v1313_v43 = vadd.f32 %v1293_v35, %v2717_v62 }
 0x50f   : > { %v1288_v27 = vadd.f32 %v1680_v49, %v1287_v23  ;;  %v1311_v41 = vadd.f32 %v1285_v20, %v2713_v59 }
 0x510   : > { %v1314_v44 = vadd.f32 %v1296_v21, %v2720_v1 }
 0x511   : > { %v1312_v45 = vadd.f32 %v1288_v27, %v2723_v3 }
 0x512   : > { %v1322_v28 = vpack.c.bf16 %v1314_v44, %v1313_v43 }
 0x513   : > { %v1321_v47 = vpack.c.bf16 %v1312_v45, %v1311_v41 }
 0x515   : > { %1989 = vmatprep.mubr.bf16.mxu1 %v1321_v47 }
 0x516   : > { %1990 = vmatmul.mubr.bf16.gmra.mrb[44].mxu1 %v1322_v28 }
 0x5d1   : > { %v1979_v31 = vpop.f32.mrb[32].mxu1 }
 0x5d2   : > { %v1435_v32 = vadd.f32 %v1979_v31, %v1689_v29  ;;  %v1426_v49 = vpop.f32.mrb[33].mxu1 }
 0x5d3   : > { %v1427_v34 = vadd.f32 %v1689_v29, %v1426_v49  ;;  %v1980_v62 = vpop.f32.mrb[34].mxu1 }
 0x5d4   : > { %1491 = vst [vmem:[%s2755_s11 + $0x10] sm:$0xff] %v1435_v32  ;;  %v1438_v59 = vadd.f32 %v1980_v62, %v1689_v29  ;;  %v1429_v1 = vpop.f32.mrb[35].mxu1 }
 0x5d5   : > { %1489 = vst [vmem:[%s2755_s11] sm:$0xff] %v1427_v34  ;;  %v1430_v3 = vadd.f32 %v1689_v29, %v1429_v1 }
 0x5d6   : > { %1492 = vst [vmem:[%s2755_s11 + $0x18] sm:$0xff] %v1438_v59 }
 0x5d7   : > { %1490 = vst [vmem:[%s2755_s11 + $0x8] sm:$0xff] %v1430_v3 }
 0x5d9   : > { %v1983_v19 = vpop.f32.mrb[36].mxu1 }
 0x5da   : > { %v1451_v50 = vadd.f32 %v1983_v19, %v1689_v29  ;;  %v1442_v37 = vpop.f32.mrb[37].mxu1 }
 0x5db   : > { %v1443_v39 = vadd.f32 %v1689_v29, %v1442_v37  ;;  %v1984_v52 = vpop.f32.mrb[38].mxu1 }
 0x5dc   : > { %1495 = vst [vmem:[%s2755_s11 + $0x30] sm:$0xff] %v1451_v50  ;;  %v1454_v40 = vadd.f32 %v1984_v52, %v1689_v29  ;;  %v1445_v42 = vpop.f32.mrb[39].mxu1 }
 0x5dd   : > { %1493 = vst [vmem:[%s2755_s11 + $0x20] sm:$0xff] %v1443_v39  ;;  %v1446_v46 = vadd.f32 %v1689_v29, %v1445_v42 }
 0x5de   : > { %1496 = vst [vmem:[%s2755_s11 + $0x38] sm:$0xff] %v1454_v40 }
 0x5df   : > { %1494 = vst [vmem:[%s2755_s11 + $0x28] sm:$0xff] %v1446_v46 }
 0x5e1   : > { %v1987_v48 = vpop.f32.mrb[40].mxu1 }
 0x5e2   : > { %v1467_v61 = vadd.f32 %v1987_v48, %v1689_v29  ;;  %v1458_v51 = vpop.f32.mrb[41].mxu1 }
 0x5e3   : > { %v1459_v30 = vadd.f32 %v1689_v29, %v1458_v51  ;;  %v1988_v53 = vpop.f32.mrb[42].mxu1 }
 0x5e4   : > { %1499 = vst [vmem:[%s2755_s11 + $0x50] sm:$0xff] %v1467_v61  ;;  %v1470_v63 = vadd.f32 %v1988_v53, %v1689_v29  ;;  %v1461_v54 = vpop.f32.mrb[43].mxu1 }
 0x5e5   : > { %1497 = vst [vmem:[%s2755_s11 + $0x40] sm:$0xff] %v1459_v30  ;;  %v1462_v0 = vadd.f32 %v1689_v29, %v1461_v54 }
 0x5e6   : > { %1500 = vst [vmem:[%s2755_s11 + $0x58] sm:$0xff] %v1470_v63 }
 0x5e7   : > { %1498 = vst [vmem:[%s2755_s11 + $0x48] sm:$0xff] %v1462_v0 }
 0x5e9   : > { %v1991_v55 = vpop.f32.mrb[44].mxu1 }
 0x5ea   : > { %v1483_v57 = vadd.f32 %v1991_v55, %v1689_v29  ;;  %v1474_v2 = vpop.f32.mrb[45].mxu1 }
 0x5eb   : > { %v1475_v58 = vadd.f32 %v1689_v29, %v1474_v2  ;;  %v1992_v60 = vpop.f32.mrb[46].mxu1 }
 0x5ec   : > { %1503 = vst [vmem:[%s2755_s11 + $0x70] sm:$0xff] %v1483_v57  ;;  %v1486_v6 = vadd.f32 %v1992_v60, %v1689_v29  ;;  %v1477_v7 = vpop.f32.mrb[47].mxu1 }
 0x5ed   : > { %1501 = vst [vmem:[%s2755_s11 + $0x60] sm:$0xff] %v1475_v58  ;;  %v1478_v4 = vadd.f32 %v1689_v29, %v1477_v7 }
 0x5ee   : > { %1504 = vst [vmem:[%s2755_s11 + $0x78] sm:$0xff] %v1486_v6 }
 0x5ef   : > { %1502 = vst [vmem:[%s2755_s11 + $0x68] sm:$0xff] %v1478_v4 }
 0x5f0   : > { %2257 = shalt.err (!%p2254_p4)
}
 0x5f1   : > { %s2258_s9 = scalar_lea.hbm %s2775_s27, 2048  ;;  %s2262_s10 = scalar_lea.hbm %s2829_s5, 4096 }
 0x5f2   : > { %p2259_p9 = scmp.ne.s32.totalorder %s2775_s27, %s2258_s9  ;;  %p2263_p8 = scmp.lt.u32.totalorder %s2775_s27, %s2829_s5 }
 0x5f3   : > { %p2264_p13 = scmp.lt.u32.totalorder %s2262_s10, %s2258_s9  ;;  %p2266_p10 = scmp.lt.u32.totalorder %s2258_s9, %s2775_s27 }
 0x5f4   : > { %p2260_p0 = pnand %p2259_p9, %p2513_p5 }
 0x5f5   : > { %p2265_p6 = por %p2264_p13, %p2263_p8 }
 0x5f6   : > { %p2261_p11 = pneg %p2260_p0 }
 0x5f7   : > { %p2267_p3 = por %p2266_p10, %p2265_p6 }
 0x5f9   : > { %p2268_p7 = pnand %p2267_p3, %p2261_p11 }
 0x5fb   : > { %2271 = shalt.err (!%p2268_p7)
}
 0x5fc   : > { %s2327_s12 = smov 128   ;;  %s2328_s26 = smov 8  }
 0x5fd   : > { %2007 = dma.vmem_to_hbm [thread:$0]  (%p2513_p5), %s2777_s24, 2048, %s2775_s27, %s1506_s22, %s2327_s12, %s2327_s12, %s2328_s26  }
 0x5fe PF: > { %s1534_s23 = sand.u32 1, %s2306_s18   ;;  %p2847_p12 = scmp.ne.s32.totalorder %s2834_s25, 0 }
 0x5ff   : > { %p2848_p1 = scmp.ge.s32.totalorder %s2318_s21, 2  ;;  %s1535_s13 = scalar_lea.sflag [#allocation4], %s1534_s23 }
 0x601   : > { %p2024_p2 = pnand %p2848_p1, %p2847_p12 }
 0x603   : > { %2301 = dma.done.wait (!%p2024_p2), %s1535_s13, 2048  }
 0x604   : > { %2303 = vsyncadd (!%p2024_p2), %s1535_s13, 4294965248  ;;  %p20_p4 = scmp.ge.s32.totalorder %s2499_s14, 4   ;;  %s2849_s18 = smov %s2310_s19 }
 0x605   : > { %s2850_s19 = smov %s2314_s20  ;;  %s2851_s20 = smov %s2509_s30 }
 0x606   : > { %s2852_s21 = smov %s2499_s14  ;;  %22 = sbr.rel (!%p20_p4) target bundleno = 7 (0x7), region = 100 }
 0x60d   :  { %1540 = vsyncpa [#allocation3], 1 }
 0x60e   :  { %1542 = vsyncpa [#allocation3 + $0x1], 1 }
 0x60f   :  { %1543 = vsyncpa [#allocation6], 1 }
 0x610   :  { %1544 = vsyncpa [#allocation9], 1 }
 0x611   :  { %1545 = vsyncpa [#allocation4], 1 }
 0x612   :  { %1547 = vsyncpa [#allocation4 + $0x1], 1 }

// kernel: tpu_custom_call.1
= control target key start
LH: loop header
LB: loop body
LE: loop exit
PB: predicated region body
PF: predicated region fallthrough
CT: control target
= control target key end

     0   :  { %10 = vsyncpa [#allocation3], 0  ;;  %s2824_s0 = inlined_call_operand.hbm [shape: bf16[256,128], index: 0, kind: input, shape index: {}]   ;;  %s2825_s1 = inlined_call_operand.hbm [shape: bf16[128,128], index: 1, kind: input, shape index: {}]   ;;  %s2826_s2 = inlined_call_operand.hbm [shape: bf16[4,128,128], index: 2, kind: input, shape index: {}]   ;;  %s2827_s3 = inlined_call_operand.hbm [shape: bf16[128,128], index: 3, kind: input, shape index: {}]   ;;  %s2828_s4 = inlined_call_operand.vmem [shape: f32[8,128], index: 4, kind: input, shape index: {}]   ;;  %s2829_s5 = inlined_call_operand.hbm [shape: f32[256,128], index: 5, kind: output, shape index: {}]  }
   0x1   :  { %12 = vsyncpa [#allocation3 + $0x1], 0 }
   0x2   :  { %13 = vsyncpa [#allocation6], 0 }
   0x3   :  { %14 = vsyncpa [#allocation9], 0 }
   0x4   :  { %15 = vsyncpa [#allocation4], 0 }
   0x5   :  { %17 = vsyncpa [#allocation4 + $0x1], 0  ;;  %s2359_s18 = smov 0   ;;  %s2361_s19 = smov 0  }
   0x6   :  { %s2363_s20 = smov 0   ;;  %s2365_s21 = smov 0  }
   0x7 LB: > { %s2380_s22 = sadd.s32 4294967295, %s2318_s21   ;;  %s1621_s23 = sadd.s32 4294967294, %s2318_s21   ;;  %s2318_s21 = sphi %s2365_s21, %s2852_s21   ;;  %s2314_s20 = sphi %s2363_s20, %s2851_s20   ;;  %s2310_s19 = sphi %s2361_s19, %s2850_s19   ;;  %s2306_s18 = sphi %s2359_s18, %s2849_s18  }
   0x8   : > { %p43_p0 = scmp.ne.s32.totalorder %s2310_s19, %s2306_s18  ;;  %p2830_p1 = scmp.eq.s32.totalorder %s2380_s22, 0 }
   0x9   : > { %p157_p3 = scmp.eq.s32.totalorder %s1621_s23, 1  ;;  %p1622_p5 = scmp.ge.s32.totalorder %s2318_s21, 1 }
   0xa   : > { %p2389_p4 = por %p2830_p1, %p43_p0  ;;  %p164_p7 = scmp.lt.s32.totalorder %s2318_s21, 3 }
   0xb   : > { %p2394_p6 = por %p157_p3, %p43_p0  ;;  %s2320_s27 = smov [#allocation5]  }
   0xc   : > { %s2833_s24 = scalar_select %p2389_p4, 1, 0 }
   0xd   : > { %s2834_s25 = scalar_select %p2394_p6, 1, 0 }
   0xe   : > { %p2399_p8 = pnand %p1622_p5, %p164_p7  ;;  %s176_s28 = sshll.u32 %s2320_s27, 4  ;;  %s2403_s28 = int_to_ptr.vmem [resolvable:$true] %s176_s28 }
   0xf   : > { %s2321_s30 = smov [#allocation7]   ;;  %s2322_s7 = smov [#allocation8]  }
  0x10   : > { %s2835_s26 = scalar_select %p2399_p8, 1, 0 }
  0x11   : > { %p2009_p9 = pneg %p2399_p8  ;;  %s189_s6 = sshll.u32 %s2321_s30, 4  ;;  %s2414_s6 = int_to_ptr.vmem [resolvable:$true] %s189_s6 }
  0x12   : > { %s2416_s8 = sshll.u32 %s2322_s7, 4  ;;  %s2130_s11 = scalar_lea.hbm %s2825_s1, 1024  ;;  %s203_s8 = int_to_ptr.vmem [resolvable:$true] %s2416_s8 }
  0x13   : > { %p2410_p11 = pnand %p2009_p9, %p2830_p1  ;;  %p2131_p12 = scmp.ne.s32.totalorder %s2825_s1, %s2130_s11 }
  0x14   : > { %p2137_p5 = scmp.lt.u32.totalorder %s2130_s11, %s2825_s1 }
  0x15   : > { %p2426_p13 = pneg %p2410_p11 }
  0x17   : > { %p2133_p0 = pnand %p2426_p13, %p2131_p12 }
  0x19   : > { %p2134_p3 = pneg %p2133_p0 }
  0x1b   : > { %p2139_p7 = pnand %p2137_p5, %p2134_p3 }
  0x1d   : > { %2142 = shalt.err (!%p2139_p7)
}
  0x1e   : > { %s2143_s17 = scalar_lea.vmem %s2403_s28, 1024  ;;  %p2151_p2 = scmp.lt.s32.totalorder %s2403_s28, %s2403_s28 }
  0x1f   : > { %p2144_p9 = scmp.ne.s32.totalorder %s2403_s28, %s2143_s17  ;;  %p2152_p6 = scmp.lt.s32.totalorder %s2143_s17, %s2143_s17 }
  0x21   : > { %p2146_p10 = pnand %p2144_p9, %p2426_p13  ;;  %p2153_p12 = por %p2152_p6, %p2151_p2 }
  0x23   : > { %p2147_p1 = pneg %p2146_p10 }
  0x25   : > { %p2154_p0 = pnand %p2153_p12, %p2147_p1 }
  0x27   : > { %2157 = shalt.err (!%p2154_p0)
}
  0x28   : > { %s2323_s23 = smov 64   ;;  %s2324_s27 = smov 4  }
  0x29   : > { %2012 = dma.hbm_to_vmem [thread:$0]  (!%p2410_p11), %s2825_s1, 1024, %s2403_s28, [#allocation6], %s2323_s23, %s2323_s23, %s2324_s27  }
  0x2a   : > { %s2158_s11 = scalar_lea.hbm %s2826_s2, 4096 }
  0x2b   : > { %p2159_p1 = scmp.ne.s32.totalorder %s2826_s2, %s2158_s11  ;;  %p2165_p10 = scmp.lt.u32.totalorder %s2158_s11, %s2826_s2 }
  0x2d   : > { %p2161_p2 = pnand %p2159_p1, %p2426_p13 }
  0x2f   : > { %p2162_p6 = pneg %p2161_p2 }
  0x31   : > { %p2167_p3 = pnand %p2165_p10, %p2162_p6 }
  0x33   : > { %2170 = shalt.err (!%p2167_p3)
}
  0x34   : > { %s2171_s28 = scalar_lea.vmem %s2414_s6, 4096  ;;  %p2179_p12 = scmp.lt.s32.totalorder %s2414_s6, %s2414_s6 }
  0x35   : > { %p2172_p5 = scmp.ne.s32.totalorder %s2414_s6, %s2171_s28  ;;  %p2180_p0 = scmp.lt.s32.totalorder %s2171_s28, %s2171_s28 }
  0x37   : > { %p2174_p7 = pnand %p2172_p5, %p2426_p13  ;;  %p2181_p1 = por %p2180_p0, %p2179_p12 }
  0x39   : > { %p2175_p9 = pneg %p2174_p7 }
  0x3b   : > { %p2182_p2 = pnand %p2181_p1, %p2175_p9 }
  0x3d   : > { %2185 = shalt.err (!%p2182_p2)
}
  0x3e   : > { %2015 = dma.hbm_to_vmem [thread:$0]  (!%p2410_p11), %s2826_s2, 4096, %s2414_s6, [#allocation6], %s2323_s23, %s2323_s23, %s2324_s27  }
  0x3f   : > { %s2186_s10 = scalar_lea.hbm %s2827_s3, 1024 }
  0x40   : > { %p2187_p6 = scmp.ne.s32.totalorder %s2827_s3, %s2186_s10  ;;  %p2193_p5 = scmp.lt.u32.totalorder %s2186_s10, %s2827_s3 }
  0x42   : > { %p2189_p10 = pnand %p2187_p6, %p2426_p13 }
  0x44   : > { %p2190_p3 = pneg %p2189_p10 }
  0x46   : > { %p2195_p7 = pnand %p2193_p5, %p2190_p3 }
  0x48   : > { %2198 = shalt.err (!%p2195_p7)
}
  0x49   : > { %s2199_s16 = scalar_lea.vmem %s203_s8, 1024  ;;  %p2207_p1 = scmp.lt.s32.totalorder %s203_s8, %s203_s8 }
  0x4a   : > { %p2200_p9 = scmp.ne.s32.totalorder %s203_s8, %s2199_s16  ;;  %p2208_p2 = scmp.lt.s32.totalorder %s2199_s16, %s2199_s16 }
  0x4c   : > { %p2202_p12 = pnand %p2200_p9, %p2426_p13  ;;  %p2209_p4 = por %p2208_p2, %p2207_p1 }
  0x4e   : > { %p2203_p0 = pneg %p2202_p12 }
  0x50   : > { %p2210_p8 = pnand %p2209_p4, %p2203_p0 }
  0x52   : > { %2213 = shalt.err (!%p2210_p8)
}
  0x53   : > { %2018 = dma.hbm_to_vmem [thread:$0]  (!%p2410_p11), %s2827_s3, 1024, %s203_s8, [#allocation9], %s2323_s23, %s2323_s23, %s2324_s27  }
  0x54   : > { %s2499_s14 = sadd.s32 1, %s2318_s21   ;;  %s30_s17 = sadd.s32 1, %s2314_s20 }
  0x55   : > { %s27_s29 = ssub.s32 %s2318_s21, %s2499_s14  ;;  %p37_p8 = scmp.ne.s32.totalorder %s2314_s20, %s2310_s19 }
  0x56   : > { %p28_p4 = scmp.eq.s32.totalorder %s27_s29, 0  ;;  %p38_p13 = scmp.eq.s32.totalorder %s2318_s21, 0 }
  0x57   : > { %p2030_p6 = scmp.lt.s32.totalorder %s2318_s21, 2  ;;  %p2838_p3 = scmp.eq.s32.totalorder %s2380_s22, 1 }
  0x58   : > { %s2509_s30 = scalar_select %p28_p4, %s2314_s20, %s30_s17  }
  0x59   : > { %p39_p10 = por %p38_p13, %p37_p8  ;;  %p2513_p5 = por %p2838_p3, %p37_p8 }
  0x5a   : > { %s219_s9 = sand.u32 1, %s2314_s20   ;;  %s1703_s10 = sshll.u32 %s2318_s21, 10 }
  0x5b   : > { %s1627_s8 = sshll.u32 %s219_s9, 6  ;;  %s2522_s13 = scalar_lea.hbm %s2824_s0, %s1703_s10 }
  0x5c   : > { %s223_s15 = scalar_lea.vmem [#allocation2], %s1627_s8  ;;  %p2524_p11 = pnand %p2030_p6, %p39_p10 }
  0x5d   : > { %s230_s16 = sshll.u32 %s223_s15, 4  ;;  %s2530_s28 = scalar_lea.sflag [#allocation3], %s219_s9  ;;  %s2528_s16 = int_to_ptr.vmem [resolvable:$true] %s230_s16 }
  0x5e   : > { %s2214_s29 = scalar_lea.hbm %s2522_s13, 1024  ;;  %p2216_p9 = pneg %p2524_p11 }
  0x5f   : > { %p2215_p7 = scmp.ne.s32.totalorder %s2522_s13, %s2214_s29  ;;  %s2219_s8 = scalar_lea.hbm %s2824_s0, 2048 }
  0x60   : > { %p2220_p1 = scmp.lt.u32.totalorder %s2522_s13, %s2824_s0  ;;  %p2221_p2 = scmp.lt.u32.totalorder %s2219_s8, %s2214_s29 }
  0x61   : > { %p2217_p12 = pnand %p2216_p9, %p2215_p7  ;;  %p2223_p8 = scmp.lt.u32.totalorder %s2214_s29, %s2522_s13 }
  0x62   : > { %p2222_p4 = por %p2221_p2, %p2220_p1 }
  0x63   : > { %p2218_p0 = pneg %p2217_p12 }
  0x64   : > { %p2224_p13 = por %p2223_p8, %p2222_p4 }
  0x66   : > { %p2225_p6 = pnand %p2224_p13, %p2218_p0 }
  0x68   : > { %2228 = shalt.err (!%p2225_p6)
}
  0x69   : > { %s2229_s9 = scalar_lea.vmem %s2528_s16, 1024  ;;  %s2325_s15 = smov [#allocation2]  }
  0x6a   : > { %p2230_p10 = scmp.ne.s32.totalorder %s2528_s16, %s2229_s9  ;;  %s2234_s17 = sshll.u32 %s2325_s15, 4  ;;  %s2235_s17 = int_to_ptr.vmem [resolvable:$false] %s2234_s17 }
  0x6b   : > { %s2236_s10 = scalar_lea.vmem %s2235_s17, 2048  ;;  %p2237_p12 = scmp.lt.s32.totalorder %s2528_s16, %s2235_s17 }
  0x6c   : > { %p2232_p3 = pnand %p2230_p10, %p2216_p9  ;;  %p2238_p1 = scmp.lt.s32.totalorder %s2236_s10, %s2229_s9 }
  0x6e   : > { %p2233_p7 = pneg %p2232_p3  ;;  %p2239_p2 = por %p2238_p1, %p2237_p12 }
  0x70   : > { %p2240_p4 = pnand %p2239_p2, %p2233_p7 }
  0x72   : > { %2243 = shalt.err (!%p2240_p4)
}
  0x73   : > { %2022 = dma.hbm_to_vmem [thread:$0]  (!%p2524_p11), %s2522_s13, 1024, %s2528_s16, %s2530_s28, %s2323_s23, %s2323_s23, %s2324_s27  }
  0x74   : > { %p2841_p9 = scmp.ne.s32.totalorder %s2835_s26, 0 }
  0x75   : > { %s2564_s29 = sand.u32 (!%p2841_p9), 1, %s2310_s19   ;;  %p2842_p0 = scmp.ne.s32.totalorder (!%p2841_p9), %s2833_s24, 0 }
  0x76   : > { %242 = sbr.rel (%p2841_p9) target bundleno = 1534 (0x5fe), region = 40  ;;  %s1631_s8 = sshll.u32 (!%p2841_p9), %s2564_s29, 6 }
  0x77   : > { %s245_s11 = scalar_lea.sflag (!%p2841_p9), [#allocation3], %s2564_s29  ;;  %s2568_s12 = scalar_lea.vmem (!%p2841_p9), [#allocation2], %s1631_s8 }
  0x7d   : > { %2289 = dma.done.wait (%p2842_p0), %s245_s11, 1024  }
  0x7e   : > { %2291 = vsyncadd (%p2842_p0), %s245_s11, 4294966272  ;;  %p2843_p11 = scmp.eq.s32.totalorder %s2380_s22, 0 }
  0x80   : > { %2293 = dma.done.wait (%p2843_p11), [#allocation6], 5120   ;;  %p2844_p8 = pmov %p2843_p11 }
  0x82   : > { %2295 = vsyncadd (%p2844_p8), [#allocation6], 4294962176  ;;  %p2845_p13 = pmov %p2844_p8 }
  0x83   : > { %p2846_p6 = pmov %p2844_p8 }
  0x84   : > { %2297 = dma.done.wait (%p2845_p13), [#allocation9], 1024  }
  0x85   : > { %2299 = vsyncadd (%p2846_p6), [#allocation9], 4294966272  ;;  %v2074_v0 = vld [vmem:[#allocation5] sm:$0xff]   ;;  %v2075_v1 = vld [vmem:[#allocation5 + $0x8] sm:$0xff]   ;;  %s1635_s17 = sshll.u32 %s2564_s29, 7  ;;  %s2326_s16 = smov [#allocation10]  }
  0x86   : > { %1801 = vmatprep.subr.bf16.mxu0 %v2074_v0  ;;  %v2076_v2 = vld [vmem:[#allocation5 + $0x10] sm:$0xff]   ;;  %v2077_v3 = vld [vmem:[#allocation5 + $0x18] sm:$0xff]   ;;  %v2082_v4 = vld [vmem:[%s2568_s12] sm:$0xff]   ;;  %s2755_s11 = scalar_lea.vmem [#allocation10], %s1635_s17  ;;  %s2248_s6 = sshll.u32 %s2326_s16, 4  ;;  %s2249_s6 = int_to_ptr.vmem [resolvable:$false] %s2248_s6 }
  0x87   : > { %1802 = vmatpush3.bf16.msra.mxu0 %v2074_v0  ;;  %1817 = vmatprep.mubr.bf16.mxu0 %v2082_v4  ;;  %v2078_v5 = vld [vmem:[#allocation5 + $0x20] sm:$0xff]   ;;  %v2079_v6 = vld [vmem:[#allocation5 + $0x28] sm:$0xff]   ;;  %v2080_v9 = vld [vmem:[#allocation5 + $0x30] sm:$0xff]   ;;  %s1519_s24 = sshll.u32 %s2755_s11, 4  ;;  %s2250_s28 = scalar_lea.vmem %s2249_s6, 4096  ;;  %s2777_s24 = int_to_ptr.vmem [resolvable:$true] %s1519_s24 }
  0x88   : > { %1803 = vmatprep.subr.bf16.mxu0 %v2075_v1  ;;  %v2090_v7 = vld [vmem:[#allocation7] sm:$0xff]   ;;  %v2091_v8 = vld [vmem:[#allocation7 + $0x8] sm:$0xff]   ;;  %v2092_v10 = vld [vmem:[#allocation7 + $0x10] sm:$0xff]   ;;  %s2244_s13 = scalar_lea.vmem %s2777_s24, 2048  ;;  %p2251_p12 = scmp.lt.s32.totalorder %s2777_s24, %s2249_s6 }
  0x89   : > { %1833 = vmatprep.subr.bf16.mxu1 %v2090_v7  ;;  %v2081_v11 = vld [vmem:[#allocation5 + $0x38] sm:$0xff]   ;;  %v2094_v13 = vld [vmem:[#allocation7 + $0x20] sm:$0xff]   ;;  %v2083_v14 = vld [vmem:[%s2568_s12 + $0x8] sm:$0xff]   ;;  %p2245_p10 = scmp.ne.s32.totalorder %s2777_s24, %s2244_s13  ;;  %p2252_p1 = scmp.lt.s32.totalorder %s2250_s28, %s2244_s13 }
  0x8a   : > { %1834 = vmatpush3.bf16.msra.mxu1 %v2090_v7  ;;  %v2093_v12 = vld [vmem:[#allocation7 + $0x18] sm:$0xff]   ;;  %v2084_v15 = vld [vmem:[%s2568_s12 + $0x10] sm:$0xff]   ;;  %v2095_v16 = vld [vmem:[#allocation7 + $0x28] sm:$0xff]  }
  0x8b   : > { %1804 = vmatpush3.bf16.msra.mxu0 %v2075_v1  ;;  %1835 = vmatprep.subr.bf16.mxu1 %v2091_v8  ;;  %v2085_v17 = vld [vmem:[%s2568_s12 + $0x18] sm:$0xff]   ;;  %v2086_v18 = vld [vmem:[%s2568_s12 + $0x20] sm:$0xff]   ;;  %v2087_v19 = vld [vmem:[%s2568_s12 + $0x28] sm:$0xff]   ;;  %p2246_p3 = pnand %p2245_p10, %p2513_p5  ;;  %p2253_p2 = por %p2252_p1, %p2251_p12 }
  0x8c   : > { %1805 = vmatprep.subr.bf16.mxu0 %v2076_v2  ;;  %v2088_v20 = vld [vmem:[%s2568_s12 + $0x30] sm:$0xff]   ;;  %v2089_v21 = vld [vmem:[%s2568_s12 + $0x38] sm:$0xff]   ;;  %v2098_v24 = vld [vmem:[#allocation7 + $0x40] sm:$0xff]   ;;  %s1704_s12 = sshll.u32 %s2380_s22, 11  ;;  %s1506_s22 = scalar_lea.sflag [#allocation4], %s2564_s29 }
  0x8d   : > { %v2096_v22 = vld [vmem:[#allocation7 + $0x30] sm:$0xff]   ;;  %v2097_v23 = vld [vmem:[#allocation7 + $0x38] sm:$0xff]   ;;  %v2099_v25 = vld [vmem:[#allocation7 + $0x48] sm:$0xff]   ;;  %s2775_s27 = scalar_lea.hbm %s2829_s5, %s1704_s12  ;;  %p2247_p7 = pneg %p2246_p3 }
  0x8e   : > { %1836 = vmatpush3.bf16.msra.mxu1 %v2091_v8  ;;  %v2100_v26 = vld [vmem:[#allocation7 + $0x50] sm:$0xff]   ;;  %v2101_v27 = vld [vmem:[#allocation7 + $0x58] sm:$0xff]   ;;  %v2102_v28 = vld [vmem:[#allocation7 + $0x60] sm:$0xff]  }
  0x8f   : > { %1806 = vmatpush3.bf16.msra.mxu0 %v2076_v2  ;;  %1837 = vmatprep.subr.bf16.mxu1 %v2092_v10  ;;  %v2103_v29 = vld [vmem:[#allocation7 + $0x68] sm:$0xff]   ;;  %v1636_v30 = vld [vmem:[%s2828_s4] ss:$0 sm:$0xff]  ;;  %p2254_p4 = pnand %p2253_p2, %p2247_p7 }
  0x90   : > { %1807 = vmatprep.subr.bf16.mxu0 %v2077_v3 }
  0x92   : > { %1838 = vmatpush3.bf16.msra.mxu1 %v2092_v10 }
  0x93   : > { %1808 = vmatpush3.bf16.msra.mxu0 %v2077_v3  ;;  %1839 = vmatprep.subr.bf16.mxu1 %v2093_v12 }
  0x94   : > { %1809 = vmatprep.subr.bf16.mxu0 %v2078_v5 }
  0x96   : > { %1840 = vmatpush3.bf16.msra.mxu1 %v2093_v12 }
  0x97   : > { %1810 = vmatpush3.bf16.msra.mxu0 %v2078_v5  ;;  %1841 = vmatprep.subr.bf16.mxu1 %v2094_v13 }
  0x98   : > { %1811 = vmatprep.subr.bf16.mxu0 %v2079_v6 }
  0x9a   : > { %1842 = vmatpush3.bf16.msra.mxu1 %v2094_v13 }
  0x9b   : > { %1812 = vmatpush3.bf16.msra.mxu0 %v2079_v6  ;;  %1843 = vmatprep.subr.bf16.mxu1 %v2095_v16 }
  0x9c   : > { %1813 = vmatprep.subr.bf16.mxu0 %v2080_v9 }
  0x9e   : > { %1844 = vmatpush3.bf16.msra.mxu1 %v2095_v16 }
  0x9f   : > { %1814 = vmatpush3.bf16.msra.mxu0 %v2080_v9  ;;  %1845 = vmatprep.subr.bf16.mxu1 %v2096_v22 }
  0xa0   : > { %1815 = vmatprep.subr.bf16.mxu0 %v2081_v11 }
  0xa2   : > { %1846 = vmatpush3.bf16.msra.mxu1 %v2096_v22 }
  0xa3   : > { %1816 = vmatpush3.bf16.msra.mxu0 %v2081_v11  ;;  %1847 = vmatprep.subr.bf16.mxu1 %v2097_v23 }
  0xa4   : > { %1865 = vmatprep.subr.bf16.mxu0 %v2098_v24 }
  0xa6   : > { %1818 = vmatmul.mubr.bf16.vlgmr.msra.gmra.mrb[0].mxu0 %v2083_v14  ;;  %1848 = vmatpush3.bf16.msra.mxu1 %v2097_v23  ;;  %v2104_v23 = vld [vmem:[#allocation7 + $0x70] sm:$0xff]  }
  0xa7   : > { %1821 = vmatprep.mubr.bf16.mxu0 %v2084_v15  ;;  %1866 = vmatpush3.bf16.msra.mxu0 %v2098_v24  ;;  %v2105_v24 = vld [vmem:[#allocation7 + $0x78] sm:$0xff]  }
  0xa8   : > { %1867 = vmatprep.subr.bf16.mxu0 %v2099_v25 }
  0xab   : > { %1868 = vmatpush3.bf16.msra.mxu0 %v2099_v25  ;;  %v2106_v25 = vld [vmem:[#allocation7 + $0x80] sm:$0xff]  }
  0xac   : > { %1869 = vmatprep.subr.bf16.mxu0 %v2100_v26  ;;  %1897 = vmatprep.subr.bf16.mxu1 %v2106_v25 }
  0xae   : > { %1822 = vmatmul.mubr.bf16.gmra.mrb[4].mxu0 %v2085_v17 }
  0xaf   : > { %1825 = vmatprep.mubr.bf16.mxu0 %v2086_v18  ;;  %1870 = vmatpush3.bf16.msra.mxu0 %v2100_v26  ;;  %v2107_v26 = vld [vmem:[#allocation7 + $0x88] sm:$0xff]  }
  0xb0   : > { %1871 = vmatprep.subr.bf16.mxu0 %v2101_v27 }
  0xb3   : > { %1872 = vmatpush3.bf16.msra.mxu0 %v2101_v27  ;;  %v2108_v27 = vld [vmem:[#allocation7 + $0x90] sm:$0xff]  }
  0xb4   : > { %1873 = vmatprep.subr.bf16.mxu0 %v2102_v28 }
  0xb6   : > { %1826 = vmatmul.mubr.bf16.gmra.mrb[8].mxu0 %v2087_v19 }
  0xb7   : > { %1829 = vmatprep.mubr.bf16.mxu0 %v2088_v20  ;;  %1874 = vmatpush3.bf16.msra.mxu0 %v2102_v28  ;;  %v2109_v28 = vld [vmem:[#allocation7 + $0x98] sm:$0xff]  }
  0xb8   : > { %1875 = vmatprep.subr.bf16.mxu0 %v2103_v29 }
  0xbb   : > { %1876 = vmatpush3.bf16.msra.mxu0 %v2103_v29  ;;  %v2110_v29 = vld [vmem:[#allocation7 + $0xa0] sm:$0xff]  }
  0xbc   : > { %1877 = vmatprep.subr.bf16.mxu0 %v2104_v23 }
  0xbe   : > { %1830 = vmatmul.mubr.bf16.gmra.mrb[12].mxu0 %v2089_v21 }
  0xbf   : > { %1878 = vmatpush3.bf16.msra.mxu0 %v2104_v23 }
  0xc0   : > { %1879 = vmatprep.subr.bf16.mxu0 %v2105_v24 }
  0xc3   : > { %1880 = vmatpush3.bf16.msra.mxu0 %v2105_v24 }
 0x179   : > { %v1819_v31 = vpop.f32.mrb[0].mxu0 }
 0x17a   : > { %v457_v32 = vpop.f32.mrb[1].mxu0  ;;  %v2595_v35 = vadd.f32 %v1819_v31, %v1636_v30 }
 0x17b   : > { %v2593_v33 = vadd.f32 %v1636_v30, %v457_v32  ;;  %v1820_v34 = vpop.f32.mrb[2].mxu0 }
 0x17c   : > { %v2597_v36 = vadd.f32 %v1820_v34, %v1636_v30  ;;  %v460_v37 = vpop.f32.mrb[3].mxu0  ;;  %v522_v42 = vmax.f32 %v2595_v35, 0.0 }
 0x17d   : > { %v2599_v38 = vadd.f32 %v1636_v30, %v460_v37  ;;  %v520_v40 = vmax.f32 %v2593_v33, 0.0 }
 0x17e   : > { %v523_v39 = vmax.f32 %v2597_v36, 0.0 }
 0x17f   : > { %v521_v41 = vmax.f32 %v2599_v38, 0.0 }
 0x180   : > { %v537_v46 = vpack.c.bf16 %v523_v39, %v522_v42 }
 0x181   : > { %v1823_v43 = vpop.f32.mrb[4].mxu0  ;;  %v536_v44 = vpack.c.bf16 %v521_v41, %v520_v40 }
 0x182   : > { %v473_v45 = vpop.f32.mrb[5].mxu0  ;;  %v2607_v49 = vadd.f32 %v1823_v43, %v1636_v30 }
 0x183   : > { %v2605_v47 = vadd.f32 %v1636_v30, %v473_v45  ;;  %v1824_v48 = vpop.f32.mrb[6].mxu0  ;;  %1849 = vmatprep.mubr.bf16.mxu1 %v536_v44 }
 0x184   : > { %v2609_v50 = vadd.f32 %v1824_v48, %v1636_v30  ;;  %v476_v51 = vpop.f32.mrb[7].mxu0  ;;  %1850 = vmatmul.mubr.bf16.vlgmr.msra.gmra.mrb[0].mxu1 %v537_v46  ;;  %v526_v56 = vmax.f32 %v2607_v49, 0.0 }
 0x185   : > { %v2611_v52 = vadd.f32 %v1636_v30, %v476_v51  ;;  %v524_v54 = vmax.f32 %v2605_v47, 0.0  ;;  %1898 = vmatpush3.bf16.msra.mxu1 %v2106_v25 }
 0x186   : > { %v527_v53 = vmax.f32 %v2609_v50, 0.0  ;;  %1899 = vmatprep.subr.bf16.mxu1 %v2107_v26 }
 0x187   : > { %v525_v55 = vmax.f32 %v2611_v52, 0.0 }
 0x188   : > { %v539_v60 = vpack.c.bf16 %v527_v53, %v526_v56 }
 0x189   : > { %v1827_v57 = vpop.f32.mrb[8].mxu0  ;;  %v538_v58 = vpack.c.bf16 %v525_v55, %v524_v54  ;;  %1900 = vmatpush3.bf16.msra.mxu1 %v2107_v26 }
 0x18a   : > { %v489_v59 = vpop.f32.mrb[9].mxu0  ;;  %v2619_v63 = vadd.f32 %v1827_v57, %v1636_v30  ;;  %1901 = vmatprep.subr.bf16.mxu1 %v2108_v27 }
 0x18b   : > { %v2617_v61 = vadd.f32 %v1636_v30, %v489_v59  ;;  %v1828_v62 = vpop.f32.mrb[10].mxu0  ;;  %1853 = vmatprep.mubr.bf16.mxu1 %v538_v58 }
 0x18c   : > { %v2621_v0 = vadd.f32 %v1828_v62, %v1636_v30  ;;  %v492_v1 = vpop.f32.mrb[11].mxu0  ;;  %1854 = vmatmul.mubr.bf16.gmra.mrb[4].mxu1 %v539_v60  ;;  %v530_v6 = vmax.f32 %v2619_v63, 0.0 }
 0x18d   : > { %v2623_v2 = vadd.f32 %v1636_v30, %v492_v1  ;;  %v528_v4 = vmax.f32 %v2617_v61, 0.0  ;;  %1902 = vmatpush3.bf16.msra.mxu1 %v2108_v27 }
 0x18e   : > { %v531_v3 = vmax.f32 %v2621_v0, 0.0  ;;  %1903 = vmatprep.subr.bf16.mxu1 %v2109_v28 }
 0x18f   : > { %v529_v5 = vmax.f32 %v2623_v2, 0.0 }
 0x190   : > { %v541_v10 = vpack.c.bf16 %v531_v3, %v530_v6 }
 0x191   : > { %v1831_v7 = vpop.f32.mrb[12].mxu0  ;;  %v540_v8 = vpack.c.bf16 %v529_v5, %v528_v4  ;;  %1904 = vmatpush3.bf16.msra.mxu1 %v2109_v28 }
 0x192   : > { %v505_v9 = vpop.f32.mrb[13].mxu0  ;;  %v2631_v13 = vadd.f32 %v1831_v7, %v1636_v30  ;;  %1905 = vmatprep.subr.bf16.mxu1 %v2110_v29 }
 0x193   : > { %v2629_v11 = vadd.f32 %v1636_v30, %v505_v9  ;;  %v1832_v12 = vpop.f32.mrb[14].mxu0  ;;  %1857 = vmatprep.mubr.bf16.mxu1 %v540_v8 }
 0x194   : > { %v2633_v14 = vadd.f32 %v1832_v12, %v1636_v30  ;;  %v508_v15 = vpop.f32.mrb[15].mxu0  ;;  %1858 = vmatmul.mubr.bf16.gmra.mrb[8].mxu1 %v541_v10  ;;  %v534_v20 = vmax.f32 %v2631_v13, 0.0 }
 0x195   : > { %v2635_v16 = vadd.f32 %v1636_v30, %v508_v15  ;;  %v532_v18 = vmax.f32 %v2629_v11, 0.0  ;;  %1906 = vmatpush3.bf16.msra.mxu1 %v2110_v29  ;;  %v1653_v30 = vld [vmem:[%s2828_s4 + $0x1] ss:$0 sm:$0xff] }
 0x196   : > { %v535_v17 = vmax.f32 %v2633_v14, 0.0 }
 0x197   : > { %v533_v19 = vmax.f32 %v2635_v16, 0.0 }
 0x198   : > { %v543_v22 = vpack.c.bf16 %v535_v17, %v534_v20 }
 0x199   : > { %v542_v21 = vpack.c.bf16 %v533_v19, %v532_v18 }
 0x19b   : > { %1861 = vmatprep.mubr.bf16.mxu1 %v542_v21 }
 0x19c   : > { %1862 = vmatmul.mubr.bf16.gmra.mrb[12].mxu1 %v543_v22 }
 0x257   : > { %v1851_v31 = vpop.f32.mrb[0].mxu1 }
 0x258   : > { %v656_v32 = vadd.f32 %v1851_v31, %v1653_v30  ;;  %v647_v34 = vpop.f32.mrb[1].mxu1 }
 0x259   : > { %v648_v37 = vadd.f32 %v1653_v30, %v647_v34  ;;  %v1852_v39 = vpop.f32.mrb[2].mxu1 }
 0x25a   : > { %v659_v40 = vadd.f32 %v1852_v39, %v1653_v30  ;;  %v650_v41 = vpop.f32.mrb[3].mxu1  ;;  %v712_v43 = vmax.f32 %v656_v32, 0.0 }
 0x25b   : > { %v651_v42 = vadd.f32 %v1653_v30, %v650_v41  ;;  %v710_v45 = vmax.f32 %v648_v37, 0.0 }
 0x25c   : > { %v713_v44 = vmax.f32 %v659_v40, 0.0 }
 0x25d   : > { %v711_v46 = vmax.f32 %v651_v42, 0.0 }
 0x25e   : > { %v727_v48 = vpack.c.bf16 %v713_v44, %v712_v43  ;;  %v2111_v44 = vld [vmem:[#allocation7 + $0xa8] sm:$0xff]  }
 0x25f   : > { %v726_v51 = vpack.c.bf16 %v711_v46, %v710_v45  ;;  %v1855_v53 = vpop.f32.mrb[4].mxu1  ;;  %1907 = vmatprep.subr.bf16.mxu1 %v2111_v44  ;;  %v2112_v45 = vld [vmem:[#allocation7 + $0xb0] sm:$0xff]   ;;  %v2113_v46 = vld [vmem:[#allocation7 + $0xb8] sm:$0xff]  }
 0x260   : > { %v672_v54 = vadd.f32 %v1855_v53, %v1653_v30  ;;  %v663_v55 = vpop.f32.mrb[5].mxu1  ;;  %1908 = vmatpush3.bf16.msra.mxu1 %v2111_v44  ;;  %v2117_v53 = vld [vmem:[#allocation7 + $0xd8] sm:$0xff]  }
 0x261   : > { %v664_v56 = vadd.f32 %v1653_v30, %v663_v55  ;;  %v1856_v57 = vpop.f32.mrb[6].mxu1  ;;  %1881 = vmatprep.mubr.bf16.mxu0 %v726_v51  ;;  %1909 = vmatprep.subr.bf16.mxu1 %v2112_v45  ;;  %v2115_v51 = vld [vmem:[#allocation7 + $0xc8] sm:$0xff]  }
 0x262   : > { %v675_v58 = vadd.f32 %v1856_v57, %v1653_v30  ;;  %v666_v59 = vpop.f32.mrb[7].mxu1  ;;  %1882 = vmatmul.mubr.bf16.vlgmr.msra.gmra.mrb[16].mxu0 %v727_v48  ;;  %v716_v62 = vmax.f32 %v672_v54, 0.0  ;;  %v2114_v48 = vld [vmem:[#allocation7 + $0xc0] sm:$0xff]   ;;  %v2119_v55 = vld [vmem:[#allocation7 + $0xe8] sm:$0xff]  }
 0x263   : > { %v667_v60 = vadd.f32 %v1653_v30, %v666_v59  ;;  %v714_v3 = vmax.f32 %v664_v56, 0.0  ;;  %1929 = vmatprep.subr.bf16.mxu0 %v2114_v48  ;;  %v2118_v54 = vld [vmem:[#allocation7 + $0xe0] sm:$0xff]  }
 0x264   : > { %v717_v1 = vmax.f32 %v675_v58, 0.0  ;;  %1910 = vmatpush3.bf16.msra.mxu1 %v2112_v45  ;;  %1930 = vmatpush3.bf16.msra.mxu0 %v2114_v48  ;;  %v2647_v56 = vld [vmem:[%s2828_s4 + $0x2] ss:$0 sm:$0xff] }
 0x265   : > { %v715_v4 = vmax.f32 %v667_v60, 0.0  ;;  %1911 = vmatprep.subr.bf16.mxu1 %v2113_v46  ;;  %1931 = vmatprep.subr.bf16.mxu0 %v2115_v51 }
 0x266   : > { %v729_v5 = vpack.c.bf16 %v717_v1, %v716_v62 }
 0x267   : > { %v728_v6 = vpack.c.bf16 %v715_v4, %v714_v3  ;;  %v1859_v7 = vpop.f32.mrb[8].mxu1 }
 0x268   : > { %v688_v8 = vadd.f32 %v1859_v7, %v1653_v30  ;;  %v679_v9 = vpop.f32.mrb[9].mxu1  ;;  %1912 = vmatpush3.bf16.msra.mxu1 %v2113_v46  ;;  %1932 = vmatpush3.bf16.msra.mxu0 %v2115_v51 }
 0x269   : > { %v680_v10 = vadd.f32 %v1653_v30, %v679_v9  ;;  %v1860_v12 = vpop.f32.mrb[10].mxu1  ;;  %1885 = vmatprep.mubr.bf16.mxu0 %v728_v6 }
 0x26a   : > { %v691_v15 = vadd.f32 %v1860_v12, %v1653_v30  ;;  %v682_v17 = vpop.f32.mrb[11].mxu1  ;;  %1886 = vmatmul.mubr.bf16.gmra.mrb[20].mxu0 %v729_v5  ;;  %v720_v19 = vmax.f32 %v688_v8, 0.0 }
 0x26b   : > { %v683_v18 = vadd.f32 %v1653_v30, %v682_v17  ;;  %v718_v21 = vmax.f32 %v680_v10, 0.0 }
 0x26c   : > { %v721_v20 = vmax.f32 %v691_v15, 0.0 }
 0x26d   : > { %v719_v22 = vmax.f32 %v683_v18, 0.0 }
 0x26e   : > { %v731_v23 = vpack.c.bf16 %v721_v20, %v720_v19 }
 0x26f   : > { %v730_v24 = vpack.c.bf16 %v719_v22, %v718_v21  ;;  %v1863_v25 = vpop.f32.mrb[12].mxu1 }
 0x270   : > { %v704_v26 = vadd.f32 %v1863_v25, %v1653_v30  ;;  %v695_v27 = vpop.f32.mrb[13].mxu1 }
 0x271   : > { %v696_v28 = vadd.f32 %v1653_v30, %v695_v27  ;;  %v1864_v29 = vpop.f32.mrb[14].mxu1  ;;  %1889 = vmatprep.mubr.bf16.mxu0 %v730_v24 }
 0x272   : > { %v707_v31 = vadd.f32 %v1864_v29, %v1653_v30  ;;  %v698_v32 = vpop.f32.mrb[15].mxu1  ;;  %1890 = vmatmul.mubr.bf16.gmra.mrb[24].mxu0 %v731_v23  ;;  %v724_v37 = vmax.f32 %v704_v26, 0.0 }
 0x273   : > { %v699_v34 = vadd.f32 %v1653_v30, %v698_v32  ;;  %v722_v40 = vmax.f32 %v696_v28, 0.0  ;;  %v2116_v30 = vld [vmem:[#allocation7 + $0xd0] sm:$0xff]  }
 0x274   : > { %v725_v39 = vmax.f32 %v707_v31, 0.0  ;;  %1933 = vmatprep.subr.bf16.mxu0 %v2116_v30 }
 0x275   : > { %v723_v41 = vmax.f32 %v699_v34, 0.0  ;;  %1934 = vmatpush3.bf16.msra.mxu0 %v2116_v30 }
 0x276   : > { %v733_v42 = vpack.c.bf16 %v725_v39, %v724_v37  ;;  %1935 = vmatprep.subr.bf16.mxu0 %v2117_v53 }
 0x277   : > { %v732_v43 = vpack.c.bf16 %v723_v41, %v722_v40 }
 0x279   : > { %1893 = vmatprep.mubr.bf16.mxu0 %v732_v43  ;;  %1936 = vmatpush3.bf16.msra.mxu0 %v2117_v53 }
 0x27a   : > { %1894 = vmatmul.mubr.bf16.gmra.mrb[28].mxu0 %v733_v42  ;;  %1937 = vmatprep.subr.bf16.mxu0 %v2118_v54 }
 0x27d   : > { %1938 = vmatpush3.bf16.msra.mxu0 %v2118_v54 }
 0x27e   : > { %1939 = vmatprep.subr.bf16.mxu0 %v2119_v55 }
 0x281   : > { %1940 = vmatpush3.bf16.msra.mxu0 %v2119_v55 }
 0x335   : > { %v1883_v57 = vpop.f32.mrb[16].mxu0 }
 0x336   : > { %v847_v58 = vadd.f32 %v1883_v57, %v2647_v56  ;;  %v838_v59 = vpop.f32.mrb[17].mxu0 }
 0x337   : > { %v839_v60 = vadd.f32 %v2647_v56, %v838_v59  ;;  %v1884_v62 = vpop.f32.mrb[18].mxu0 }
 0x338   : > { %v850_v1 = vadd.f32 %v1884_v62, %v2647_v56  ;;  %v841_v3 = vpop.f32.mrb[19].mxu0  ;;  %v2657_v6 = vadd.f32 %v847_v58, %v2595_v35 }
 0x339   : > { %v2653_v4 = vadd.f32 %v839_v60, %v2593_v33  ;;  %v842_v5 = vadd.f32 %v2647_v56, %v841_v3 }
 0x33a   : > { %v2660_v7 = vadd.f32 %v850_v1, %v2597_v36  ;;  %v919_v33 = vmax.f32 %v2657_v6, 0.0 }
 0x33b   : > { %v2663_v8 = vadd.f32 %v842_v5, %v2599_v38  ;;  %v917_v10 = vmax.f32 %v2653_v4, 0.0 }
 0x33c   : > { %v920_v9 = vmax.f32 %v2660_v7, 0.0 }
 0x33d   : > { %v918_v12 = vmax.f32 %v2663_v8, 0.0  ;;  %v1887_v15 = vpop.f32.mrb[20].mxu0 }
 0x33e   : > { %v863_v17 = vadd.f32 %v1887_v15, %v2647_v56  ;;  %v854_v18 = vpop.f32.mrb[21].mxu0  ;;  %v934_v20 = vpack.c.bf16 %v920_v9, %v919_v33  ;;  %v2123_v15 = vld [vmem:[#allocation8 + $0x8] sm:$0xff]   ;;  %v2124_v33 = vld [vmem:[#allocation8 + $0x10] sm:$0xff]  }
 0x33f   : > { %v855_v35 = vadd.f32 %v2647_v56, %v854_v18  ;;  %v1888_v19 = vpop.f32.mrb[22].mxu0  ;;  %v933_v36 = vpack.c.bf16 %v918_v12, %v917_v10  ;;  %v2126_v18 = vld [vmem:[#allocation8 + $0x20] sm:$0xff]  }
 0x340   : > { %v866_v38 = vadd.f32 %v1888_v19, %v2647_v56  ;;  %v857_v21 = vpop.f32.mrb[23].mxu0  ;;  %v2677_v24 = vadd.f32 %v863_v17, %v2607_v49  ;;  %v2125_v17 = vld [vmem:[#allocation8 + $0x18] sm:$0xff]   ;;  %v1671_v19 = vld [vmem:[%s2828_s4 + $0x3] ss:$0 sm:$0xff] }
 0x341   : > { %v2673_v22 = vadd.f32 %v855_v35, %v2605_v47  ;;  %v858_v23 = vadd.f32 %v2647_v56, %v857_v21  ;;  %1913 = vmatprep.mubr.bf16.mxu1 %v933_v36  ;;  %v2127_v35 = vld [vmem:[#allocation8 + $0x28] sm:$0xff]  }
 0x342   : > { %v2680_v25 = vadd.f32 %v866_v38, %v2609_v50  ;;  %1914 = vmatmul.mubr.bf16.vlgmr.msra.gmra.mrb[16].mxu1 %v934_v20  ;;  %v923_v31 = vmax.f32 %v2677_v24, 0.0 }
 0x343   : > { %v2683_v26 = vadd.f32 %v858_v23, %v2611_v52  ;;  %v921_v28 = vmax.f32 %v2673_v22, 0.0 }
 0x344   : > { %v924_v27 = vmax.f32 %v2680_v25, 0.0 }
 0x345   : > { %v922_v47 = vmax.f32 %v2683_v26, 0.0  ;;  %v1891_v29 = vpop.f32.mrb[24].mxu0 }
 0x346   : > { %v879_v32 = vadd.f32 %v1891_v29, %v2647_v56  ;;  %v870_v49 = vpop.f32.mrb[25].mxu0  ;;  %v936_v40 = vpack.c.bf16 %v924_v27, %v923_v31 }
 0x347   : > { %v871_v34 = vadd.f32 %v2647_v56, %v870_v49  ;;  %v1892_v50 = vpop.f32.mrb[26].mxu0  ;;  %v935_v37 = vpack.c.bf16 %v922_v47, %v921_v28 }
 0x348   : > { %v882_v39 = vadd.f32 %v1892_v50, %v2647_v56  ;;  %v873_v52 = vpop.f32.mrb[27].mxu0  ;;  %v2697_v43 = vadd.f32 %v879_v32, %v2619_v63 }
 0x349   : > { %v2693_v41 = vadd.f32 %v871_v34, %v2617_v61  ;;  %v874_v42 = vadd.f32 %v2647_v56, %v873_v52  ;;  %1917 = vmatprep.mubr.bf16.mxu1 %v935_v37 }
 0x34a   : > { %v2700_v44 = vadd.f32 %v882_v39, %v2621_v0  ;;  %1918 = vmatmul.mubr.bf16.gmra.mrb[20].mxu1 %v936_v40  ;;  %v927_v30 = vmax.f32 %v2697_v43, 0.0 }
 0x34b   : > { %v2703_v45 = vadd.f32 %v874_v42, %v2623_v2  ;;  %v925_v48 = vmax.f32 %v2693_v41, 0.0 }
 0x34c   : > { %v928_v46 = vmax.f32 %v2700_v44, 0.0 }
 0x34d   : > { %v926_v61 = vmax.f32 %v2703_v45, 0.0  ;;  %v1895_v51 = vpop.f32.mrb[28].mxu0 }
 0x34e   : > { %v895_v53 = vadd.f32 %v1895_v51, %v2647_v56  ;;  %v886_v63 = vpop.f32.mrb[29].mxu0  ;;  %v938_v58 = vpack.c.bf16 %v928_v46, %v927_v30 }
 0x34f   : > { %v887_v54 = vadd.f32 %v2647_v56, %v886_v63  ;;  %v1896_v0 = vpop.f32.mrb[30].mxu0  ;;  %v937_v55 = vpack.c.bf16 %v926_v61, %v925_v48 }
 0x350   : > { %v898_v57 = vadd.f32 %v1896_v0, %v2647_v56  ;;  %v889_v2 = vpop.f32.mrb[31].mxu0  ;;  %v2717_v62 = vadd.f32 %v895_v53, %v2631_v13  ;;  %v2120_v13 = vld [vmem:[#allocation7 + $0xf0] sm:$0xff]  }
 0x351   : > { %v2713_v59 = vadd.f32 %v887_v54, %v2629_v11  ;;  %v890_v60 = vadd.f32 %v2647_v56, %v889_v2  ;;  %1921 = vmatprep.mubr.bf16.mxu1 %v937_v55  ;;  %1941 = vmatprep.subr.bf16.mxu0 %v2120_v13 }
 0x352   : > { %v2720_v1 = vadd.f32 %v898_v57, %v2633_v14  ;;  %1922 = vmatmul.mubr.bf16.gmra.mrb[24].mxu1 %v938_v58  ;;  %v931_v10 = vmax.f32 %v2717_v62, 0.0  ;;  %1942 = vmatpush3.bf16.msra.mxu0 %v2120_v13  ;;  %v2121_v14 = vld [vmem:[#allocation7 + $0xf8] sm:$0xff]  }
 0x353   : > { %v2723_v3 = vadd.f32 %v890_v60, %v2635_v16  ;;  %v929_v9 = vmax.f32 %v2713_v59, 0.0  ;;  %1943 = vmatprep.subr.bf16.mxu0 %v2121_v14  ;;  %v2122_v16 = vld [vmem:[#allocation8] sm:$0xff]  }
 0x354   : > { %v932_v5 = vmax.f32 %v2720_v1, 0.0  ;;  %1961 = vmatprep.subr.bf16.mxu1 %v2122_v16 }
 0x355   : > { %v930_v11 = vmax.f32 %v2723_v3, 0.0  ;;  %1962 = vmatpush3.bf16.msra.mxu1 %v2122_v16 }
 0x356   : > { %v940_v12 = vpack.c.bf16 %v932_v5, %v931_v10  ;;  %1944 = vmatpush3.bf16.msra.mxu0 %v2121_v14  ;;  %1963 = vmatprep.subr.bf16.mxu1 %v2123_v15 }
 0x357   : > { %v939_v56 = vpack.c.bf16 %v930_v11, %v929_v9 }
 0x359   : > { %1925 = vmatprep.mubr.bf16.mxu1 %v939_v56  ;;  %1964 = vmatpush3.bf16.msra.mxu1 %v2123_v15 }
 0x35a   : > { %1926 = vmatmul.mubr.bf16.gmra.mrb[28].mxu1 %v940_v12  ;;  %1965 = vmatprep.subr.bf16.mxu1 %v2124_v33 }
 0x35d   : > { %1966 = vmatpush3.bf16.msra.mxu1 %v2124_v33 }
 0x35e   : > { %1967 = vmatprep.subr.bf16.mxu1 %v2125_v17 }
 0x361   : > { %1968 = vmatpush3.bf16.msra.mxu1 %v2125_v17 }
 0x362   : > { %1969 = vmatprep.subr.bf16.mxu1 %v2126_v18 }
 0x365   : > { %1970 = vmatpush3.bf16.msra.mxu1 %v2126_v18 }
 0x366   : > { %1971 = vmatprep.subr.bf16.mxu1 %v2127_v35 }
 0x369   : > { %1972 = vmatpush3.bf16.msra.mxu1 %v2127_v35 }
 0x415   : > { %v1915_v36 = vpop.f32.mrb[16].mxu1 }
 0x416   : > { %v1054_v20 = vadd.f32 %v1915_v36, %v1671_v19  ;;  %v1045_v38 = vpop.f32.mrb[17].mxu1 }
 0x417   : > { %v1046_v21 = vadd.f32 %v1671_v19, %v1045_v38  ;;  %v1916_v23 = vpop.f32.mrb[18].mxu1 }
 0x418   : > { %v1057_v27 = vadd.f32 %v1916_v23, %v1671_v19  ;;  %v1048_v28 = vpop.f32.mrb[19].mxu1  ;;  %v1110_v29 = vmax.f32 %v1054_v20, 0.0 }
 0x419   : > { %v1049_v47 = vadd.f32 %v1671_v19, %v1048_v28  ;;  %v1108_v32 = vmax.f32 %v1046_v21, 0.0 }
 0x41a   : > { %v1111_v31 = vmax.f32 %v1057_v27, 0.0 }
 0x41b   : > { %v1109_v49 = vmax.f32 %v1049_v47, 0.0 }
 0x41c   : > { %v1125_v34 = vpack.c.bf16 %v1111_v31, %v1110_v29  ;;  %v2128_v31 = vld [vmem:[#allocation8 + $0x30] sm:$0xff]  }
 0x41d   : > { %v1124_v50 = vpack.c.bf16 %v1109_v49, %v1108_v32  ;;  %v1919_v37 = vpop.f32.mrb[20].mxu1  ;;  %1973 = vmatprep.subr.bf16.mxu1 %v2128_v31  ;;  %v2129_v32 = vld [vmem:[#allocation8 + $0x38] sm:$0xff]   ;;  %v1680_v49 = vld [vmem:[%s2828_s4 + $0x4] ss:$0 sm:$0xff] }
 0x41e   : > { %v1070_v39 = vadd.f32 %v1919_v37, %v1671_v19  ;;  %v1061_v52 = vpop.f32.mrb[21].mxu1  ;;  %1974 = vmatpush3.bf16.msra.mxu1 %v2128_v31 }
 0x41f   : > { %v1062_v40 = vadd.f32 %v1671_v19, %v1061_v52  ;;  %v1920_v42 = vpop.f32.mrb[22].mxu1  ;;  %1945 = vmatprep.mubr.bf16.mxu0 %v1124_v50  ;;  %1975 = vmatprep.subr.bf16.mxu1 %v2129_v32 }
 0x420   : > { %v1073_v46 = vadd.f32 %v1920_v42, %v1671_v19  ;;  %v1064_v48 = vpop.f32.mrb[23].mxu1  ;;  %1946 = vmatmul.mubr.bf16.vlgmr.msra.gmra.mrb[32].mxu0 %v1125_v34  ;;  %v1114_v51 = vmax.f32 %v1070_v39, 0.0 }
 0x421   : > { %v1065_v61 = vadd.f32 %v1671_v19, %v1064_v48  ;;  %v1112_v53 = vmax.f32 %v1062_v40, 0.0 }
 0x422   : > { %v1115_v30 = vmax.f32 %v1073_v46, 0.0  ;;  %1976 = vmatpush3.bf16.msra.mxu1 %v2129_v32 }
 0x423   : > { %v1113_v63 = vmax.f32 %v1065_v61, 0.0 }
 0x424   : > { %v1127_v54 = vpack.c.bf16 %v1115_v30, %v1114_v51 }
 0x425   : > { %v1126_v0 = vpack.c.bf16 %v1113_v63, %v1112_v53  ;;  %v1923_v55 = vpop.f32.mrb[24].mxu1 }
 0x426   : > { %v1086_v57 = vadd.f32 %v1923_v55, %v1671_v19  ;;  %v1077_v2 = vpop.f32.mrb[25].mxu1 }
 0x427   : > { %v1078_v58 = vadd.f32 %v1671_v19, %v1077_v2  ;;  %v1924_v60 = vpop.f32.mrb[26].mxu1  ;;  %1949 = vmatprep.mubr.bf16.mxu0 %v1126_v0 }
 0x428   : > { %v1089_v5 = vadd.f32 %v1924_v60, %v1671_v19  ;;  %v1080_v9 = vpop.f32.mrb[27].mxu1  ;;  %1950 = vmatmul.mubr.bf16.gmra.mrb[36].mxu0 %v1127_v54  ;;  %v1118_v10 = vmax.f32 %v1086_v57, 0.0 }
 0x429   : > { %v1081_v11 = vadd.f32 %v1671_v19, %v1080_v9  ;;  %v1116_v12 = vmax.f32 %v1078_v58, 0.0 }
 0x42a   : > { %v1119_v56 = vmax.f32 %v1089_v5, 0.0 }
 0x42b   : > { %v1117_v13 = vmax.f32 %v1081_v11, 0.0 }
 0x42c   : > { %v1129_v14 = vpack.c.bf16 %v1119_v56, %v1118_v10 }
 0x42d   : > { %v1128_v16 = vpack.c.bf16 %v1117_v13, %v1116_v12  ;;  %v1927_v15 = vpop.f32.mrb[28].mxu1 }
 0x42e   : > { %v1102_v33 = vadd.f32 %v1927_v15, %v1671_v19  ;;  %v1093_v17 = vpop.f32.mrb[29].mxu1 }
 0x42f   : > { %v1094_v18 = vadd.f32 %v1671_v19, %v1093_v17  ;;  %v1928_v35 = vpop.f32.mrb[30].mxu1  ;;  %1953 = vmatprep.mubr.bf16.mxu0 %v1128_v16 }
 0x430   : > { %v1105_v36 = vadd.f32 %v1928_v35, %v1671_v19  ;;  %v1096_v20 = vpop.f32.mrb[31].mxu1  ;;  %1954 = vmatmul.mubr.bf16.gmra.mrb[40].mxu0 %v1129_v14  ;;  %v1122_v21 = vmax.f32 %v1102_v33, 0.0 }
 0x431   : > { %v1097_v38 = vadd.f32 %v1671_v19, %v1096_v20  ;;  %v1120_v27 = vmax.f32 %v1094_v18, 0.0 }
 0x432   : > { %v1123_v23 = vmax.f32 %v1105_v36, 0.0 }
 0x433   : > { %v1121_v28 = vmax.f32 %v1097_v38, 0.0 }
 0x434   : > { %v1131_v47 = vpack.c.bf16 %v1123_v23, %v1122_v21 }
 0x435   : > { %v1130_v29 = vpack.c.bf16 %v1121_v28, %v1120_v27 }
 0x437   : > { %1957 = vmatprep.mubr.bf16.mxu0 %v1130_v29  ;;  %v1689_v29 = vld [vmem:[%s2828_s4 + $0x5] ss:$0 sm:$0xff] }
 0x438   : > { %1958 = vmatmul.mubr.bf16.gmra.mrb[44].mxu0 %v1131_v47 }
 0x4f3   : > { %v1947_v34 = vpop.f32.mrb[32].mxu0 }
 0x4f4   : > { %v1245_v19 = vadd.f32 %v1947_v34, %v1680_v49  ;;  %v1236_v50 = vpop.f32.mrb[33].mxu0 }
 0x4f5   : > { %v1237_v37 = vadd.f32 %v1680_v49, %v1236_v50  ;;  %v1948_v39 = vpop.f32.mrb[34].mxu0 }
 0x4f6   : > { %v1248_v52 = vadd.f32 %v1948_v39, %v1680_v49  ;;  %v1239_v40 = vpop.f32.mrb[35].mxu0  ;;  %v1301_v46 = vadd.f32 %v1245_v19, %v2657_v6 }
 0x4f7   : > { %v1240_v42 = vadd.f32 %v1680_v49, %v1239_v40  ;;  %v1299_v61 = vadd.f32 %v1237_v37, %v2653_v4 }
 0x4f8   : > { %v1302_v48 = vadd.f32 %v1248_v52, %v2660_v7 }
 0x4f9   : > { %v1300_v51 = vadd.f32 %v1240_v42, %v2663_v8 }
 0x4fa   : > { %v1316_v30 = vpack.c.bf16 %v1302_v48, %v1301_v46 }
 0x4fb   : > { %v1951_v53 = vpop.f32.mrb[36].mxu0  ;;  %v1315_v63 = vpack.c.bf16 %v1300_v51, %v1299_v61 }
 0x4fc   : > { %v1261_v54 = vadd.f32 %v1951_v53, %v1680_v49  ;;  %v1252_v0 = vpop.f32.mrb[37].mxu0 }
 0x4fd   : > { %v1253_v55 = vadd.f32 %v1680_v49, %v1252_v0  ;;  %v1952_v57 = vpop.f32.mrb[38].mxu0  ;;  %1977 = vmatprep.mubr.bf16.mxu1 %v1315_v63 }
 0x4fe   : > { %v1264_v2 = vadd.f32 %v1952_v57, %v1680_v49  ;;  %v1255_v58 = vpop.f32.mrb[39].mxu0  ;;  %1978 = vmatmul.mubr.bf16.vlgmr.msra.gmra.mrb[32].mxu1 %v1316_v30  ;;  %v1305_v6 = vadd.f32 %v1261_v54, %v2677_v24 }
 0x4ff   : > { %v1256_v60 = vadd.f32 %v1680_v49, %v1255_v58  ;;  %v1303_v4 = vadd.f32 %v1253_v55, %v2673_v22 }
 0x500   : > { %v1306_v7 = vadd.f32 %v1264_v2, %v2680_v25 }
 0x501   : > { %v1304_v8 = vadd.f32 %v1256_v60, %v2683_v26 }
 0x502   : > { %v1318_v5 = vpack.c.bf16 %v1306_v7, %v1305_v6 }
 0x503   : > { %v1955_v9 = vpop.f32.mrb[40].mxu0  ;;  %v1317_v11 = vpack.c.bf16 %v1304_v8, %v1303_v4 }
 0x504   : > { %v1277_v10 = vadd.f32 %v1955_v9, %v1680_v49  ;;  %v1268_v56 = vpop.f32.mrb[41].mxu0 }
 0x505   : > { %v1269_v12 = vadd.f32 %v1680_v49, %v1268_v56  ;;  %v1956_v13 = vpop.f32.mrb[42].mxu0  ;;  %1981 = vmatprep.mubr.bf16.mxu1 %v1317_v11 }
 0x506   : > { %v1280_v14 = vadd.f32 %v1956_v13, %v1680_v49  ;;  %v1271_v16 = vpop.f32.mrb[43].mxu0  ;;  %1982 = vmatmul.mubr.bf16.gmra.mrb[36].mxu1 %v1318_v5  ;;  %v1309_v24 = vadd.f32 %v1277_v10, %v2697_v43 }
 0x507   : > { %v1272_v15 = vadd.f32 %v1680_v49, %v1271_v16  ;;  %v1307_v22 = vadd.f32 %v1269_v12, %v2693_v41 }
 0x508   : > { %v1310_v25 = vadd.f32 %v1280_v14, %v2700_v44 }
 0x509   : > { %v1308_v26 = vadd.f32 %v1272_v15, %v2703_v45 }
 0x50a   : > { %v1320_v33 = vpack.c.bf16 %v1310_v25, %v1309_v24 }
 0x50b   : > { %v1959_v17 = vpop.f32.mrb[44].mxu0  ;;  %v1319_v18 = vpack.c.bf16 %v1308_v26, %v1307_v22 }
 0x50c   : > { %v1293_v35 = vadd.f32 %v1959_v17, %v1680_v49  ;;  %v1284_v36 = vpop.f32.mrb[45].mxu0 }
 0x50d   : > { %v1285_v20 = vadd.f32 %v1680_v49, %v1284_v36  ;;  %v1960_v38 = vpop.f32.mrb[46].mxu0  ;;  %1985 = vmatprep.mubr.bf16.mxu1 %v1319_v18 }
 0x50e   : > { %v1296_v21 = vadd.f32 %v1960_v38, %v1680_v49  ;;  %v1287_v23 = vpop.f32.mrb[47].mxu0  ;;  %1986 = vmatmul.mubr.bf16.gmra.mrb[40].mxu1 %v1320_v33  ;;  %v1313_v43 = vadd.f32 %v1293_v35, %v2717_v62 }
 0x50f   : > { %v1288_v27 = vadd.f32 %v1680_v49, %v1287_v23  ;;  %v1311_v41 = vadd.f32 %v1285_v20, %v2713_v59 }
 0x510   : > { %v1314_v44 = vadd.f32 %v1296_v21, %v2720_v1 }
 0x511   : > { %v1312_v45 = vadd.f32 %v1288_v27, %v2723_v3 }
 0x512   : > { %v1322_v28 = vpack.c.bf16 %v1314_v44, %v1313_v43 }
 0x513   : > { %v1321_v47 = vpack.c.bf16 %v1312_v45, %v1311_v41 }
 0x515   : > { %1989 = vmatprep.mubr.bf16.mxu1 %v1321_v47 }
 0x516   : > { %1990 = vmatmul.mubr.bf16.gmra.mrb[44].mxu1 %v1322_v28 }
 0x5d1   : > { %v1979_v31 = vpop.f32.mrb[32].mxu1 }
 0x5d2   : > { %v1435_v32 = vadd.f32 %v1979_v31, %v1689_v29  ;;  %v1426_v49 = vpop.f32.mrb[33].mxu1 }
 0x5d3   : > { %v1427_v34 = vadd.f32 %v1689_v29, %v1426_v49  ;;  %v1980_v62 = vpop.f32.mrb[34].mxu1 }
 0x5d4   : > { %1491 = vst [vmem:[%s2755_s11 + $0x10] sm:$0xff] %v1435_v32  ;;  %v1438_v59 = vadd.f32 %v1980_v62, %v1689_v29  ;;  %v1429_v1 = vpop.f32.mrb[35].mxu1 }
 0x5d5   : > { %1489 = vst [vmem:[%s2755_s11] sm:$0xff] %v1427_v34  ;;  %v1430_v3 = vadd.f32 %v1689_v29, %v1429_v1 }
 0x5d6   : > { %1492 = vst [vmem:[%s2755_s11 + $0x18] sm:$0xff] %v1438_v59 }
 0x5d7   : > { %1490 = vst [vmem:[%s2755_s11 + $0x8] sm:$0xff] %v1430_v3 }
 0x5d9   : > { %v1983_v19 = vpop.f32.mrb[36].mxu1 }
 0x5da   : > { %v1451_v50 = vadd.f32 %v1983_v19, %v1689_v29  ;;  %v1442_v37 = vpop.f32.mrb[37].mxu1 }
 0x5db   : > { %v1443_v39 = vadd.f32 %v1689_v29, %v1442_v37  ;;  %v1984_v52 = vpop.f32.mrb[38].mxu1 }
 0x5dc   : > { %1495 = vst [vmem:[%s2755_s11 + $0x30] sm:$0xff] %v1451_v50  ;;  %v1454_v40 = vadd.f32 %v1984_v52, %v1689_v29  ;;  %v1445_v42 = vpop.f32.mrb[39].mxu1 }
 0x5dd   : > { %1493 = vst [vmem:[%s2755_s11 + $0x20] sm:$0xff] %v1443_v39  ;;  %v1446_v46 = vadd.f32 %v1689_v29, %v1445_v42 }
 0x5de   : > { %1496 = vst [vmem:[%s2755_s11 + $0x38] sm:$0xff] %v1454_v40 }
 0x5df   : > { %1494 = vst [vmem:[%s2755_s11 + $0x28] sm:$0xff] %v1446_v46 }
 0x5e1   : > { %v1987_v48 = vpop.f32.mrb[40].mxu1 }
 0x5e2   : > { %v1467_v61 = vadd.f32 %v1987_v48, %v1689_v29  ;;  %v1458_v51 = vpop.f32.mrb[41].mxu1 }
 0x5e3   : > { %v1459_v30 = vadd.f32 %v1689_v29, %v1458_v51  ;;  %v1988_v53 = vpop.f32.mrb[42].mxu1 }
 0x5e4   : > { %1499 = vst [vmem:[%s2755_s11 + $0x50] sm:$0xff] %v1467_v61  ;;  %v1470_v63 = vadd.f32 %v1988_v53, %v1689_v29  ;;  %v1461_v54 = vpop.f32.mrb[43].mxu1 }
 0x5e5   : > { %1497 = vst [vmem:[%s2755_s11 + $0x40] sm:$0xff] %v1459_v30  ;;  %v1462_v0 = vadd.f32 %v1689_v29, %v1461_v54 }
 0x5e6   : > { %1500 = vst [vmem:[%s2755_s11 + $0x58] sm:$0xff] %v1470_v63 }
 0x5e7   : > { %1498 = vst [vmem:[%s2755_s11 + $0x48] sm:$0xff] %v1462_v0 }
 0x5e9   : > { %v1991_v55 = vpop.f32.mrb[44].mxu1 }
 0x5ea   : > { %v1483_v57 = vadd.f32 %v1991_v55, %v1689_v29  ;;  %v1474_v2 = vpop.f32.mrb[45].mxu1 }
 0x5eb   : > { %v1475_v58 = vadd.f32 %v1689_v29, %v1474_v2  ;;  %v1992_v60 = vpop.f32.mrb[46].mxu1 }
 0x5ec   : > { %1503 = vst [vmem:[%s2755_s11 + $0x70] sm:$0xff] %v1483_v57  ;;  %v1486_v6 = vadd.f32 %v1992_v60, %v1689_v29  ;;  %v1477_v7 = vpop.f32.mrb[47].mxu1 }
 0x5ed   : > { %1501 = vst [vmem:[%s2755_s11 + $0x60] sm:$0xff] %v1475_v58  ;;  %v1478_v4 = vadd.f32 %v1689_v29, %v1477_v7 }
 0x5ee   : > { %1504 = vst [vmem:[%s2755_s11 + $0x78] sm:$0xff] %v1486_v6 }
 0x5ef   : > { %1502 = vst [vmem:[%s2755_s11 + $0x68] sm:$0xff] %v1478_v4 }
 0x5f0   : > { %2257 = shalt.err (!%p2254_p4)
}
 0x5f1   : > { %s2258_s9 = scalar_lea.hbm %s2775_s27, 2048  ;;  %s2262_s10 = scalar_lea.hbm %s2829_s5, 4096 }
 0x5f2   : > { %p2259_p9 = scmp.ne.s32.totalorder %s2775_s27, %s2258_s9  ;;  %p2263_p8 = scmp.lt.u32.totalorder %s2775_s27, %s2829_s5 }
 0x5f3   : > { %p2264_p13 = scmp.lt.u32.totalorder %s2262_s10, %s2258_s9  ;;  %p2266_p10 = scmp.lt.u32.totalorder %s2258_s9, %s2775_s27 }
 0x5f4   : > { %p2260_p0 = pnand %p2259_p9, %p2513_p5 }
 0x5f5   : > { %p2265_p6 = por %p2264_p13, %p2263_p8 }
 0x5f6   : > { %p2261_p11 = pneg %p2260_p0 }
 0x5f7   : > { %p2267_p3 = por %p2266_p10, %p2265_p6 }
 0x5f9   : > { %p2268_p7 = pnand %p2267_p3, %p2261_p11 }
 0x5fb   : > { %2271 = shalt.err (!%p2268_p7)
}
 0x5fc   : > { %s2327_s12 = smov 128   ;;  %s2328_s26 = smov 8  }
 0x5fd   : > { %2007 = dma.vmem_to_hbm [thread:$0]  (%p2513_p5), %s2777_s24, 2048, %s2775_s27, %s1506_s22, %s2327_s12, %s2327_s12, %s2328_s26  }
 0x5fe PF: > { %s1534_s23 = sand.u32 1, %s2306_s18   ;;  %p2847_p12 = scmp.ne.s32.totalorder %s2834_s25, 0 }
 0x5ff   : > { %p2848_p1 = scmp.ge.s32.totalorder %s2318_s21, 2  ;;  %s1535_s13 = scalar_lea.sflag [#allocation4], %s1534_s23 }
 0x601   : > { %p2024_p2 = pnand %p2848_p1, %p2847_p12 }
 0x603   : > { %2301 = dma.done.wait (!%p2024_p2), %s1535_s13, 2048  }
 0x604   : > { %2303 = vsyncadd (!%p2024_p2), %s1535_s13, 4294965248  ;;  %p20_p4 = scmp.ge.s32.totalorder %s2499_s14, 4   ;;  %s2849_s18 = smov %s2310_s19 }
 0x605   : > { %s2850_s19 = smov %s2314_s20  ;;  %s2851_s20 = smov %s2509_s30 }
 0x606   : > { %s2852_s21 = smov %s2499_s14  ;;  %22 = sbr.rel (!%p20_p4) target bundleno = 7 (0x7), region = 100 }
 0x60d   :  { %1540 = vsyncpa [#allocation3], 1 }
 0x60e   :  { %1542 = vsyncpa [#allocation3 + $0x1], 1 }
 0x60f   :  { %1543 = vsyncpa [#allocation6], 1 }
 0x610   :  { %1544 = vsyncpa [#allocation9], 1 }
 0x611   :  { %1545 = vsyncpa [#allocation4], 1 }
 0x612   :  { %1547 = vsyncpa [#allocation4 + $0x1], 1 }

</bundles_post_ra>
